<compile_context>
chip_gen: v7x
topology: tpu7x:2x2x1
jax: 0.10.0
libtpu: 0.0.40
codegen_flags: <defaults>
</compile_context>

<pallas_src>
import jax
import jax.numpy as jnp
from jax.experimental import pallas as pl
from jax.experimental.pallas import tpu as pltpu


F_SIZE = 32  # hidden size fixed inside FlowSCConv.__init__


def _relu(x):
    return jnp.maximum(x, 0.0)


# ---------------------------------------------------------------------------
# Fused kernel: 4 SCConv layers + mean-pool + MLP + softmax, all VMEM-resident
# ---------------------------------------------------------------------------
def fused_flow_scconv_kernel(
        x0_ref, x1_ref, x2_ref,
        op0_ref, op1_ref, op2_ref,
        w0a_ref, w1a_ref, w2a_ref,          # layer 1 (concat per source)
        w0b_ref, w1b_ref, w2b_ref,          # layer 2
        w0c_ref, w1c_ref, w2c_ref,          # layer 3
        w4n2e_ref, w4e2e_ref, w4t2e_ref,    # layer 4 (y1 path only)
        pool_ref, m1w_ref, m1b_ref, m2w_ref, m2b_ref,
        out_ref):
    f32 = jnp.float32
    F = F_SIZE

    def dot(a, b):
        return jnp.dot(a, b, preferred_element_type=f32)

    # operators stay in registers/VMEM for all 4 layers
    op0 = op0_ref[...]   # [n0, n0+n1]    = [L0 | D1invB1]
    op1 = op1_ref[...]   # [n1, n0+n1+n2] = [D2B1TD1inv | L1 | B2D3]
    op2 = op2_ref[...]   # [n2, n1+n2]    = [B2TD2inv | L2]

    def layer(x0, x1, x2, w0, w1, w2):
        # wide feature matmuls: N = 2F / 3F / 2F
        z0 = dot(x0, w0)   # [n0, 2F] = [X0Wn2n | X0Wn2e]
        z1 = dot(x1, w1)   # [n1, 3F] = [X1We2n | X1We2e | X1We2t]
        z2 = dot(x2, w2)   # [n2, 2F] = [X2Wt2e | X2Wt2t]
        # K-stacked inputs for the fused operator matmuls
        s0 = jnp.concatenate([z0[:, :F],       z1[:, :F]], axis=0)
        s1 = jnp.concatenate([z0[:, F:2 * F],  z1[:, F:2 * F], z2[:, :F]], axis=0)
        s2 = jnp.concatenate([z1[:, 2 * F:3 * F], z2[:, F:2 * F]], axis=0)
        y0 = 0.5 * _relu(dot(op0, s0))
        y1 = (1.0 / 3.0) * _relu(dot(op1, s1))
        y2 = 0.5 * _relu(dot(op2, s2))
        return y0, y1, y2

    x0 = x0_ref[...]
    x1 = x1_ref[...]
    x2 = x2_ref[...]

    x0, x1, x2 = layer(x0, x1, x2, w0a_ref[...], w1a_ref[...], w2a_ref[...])
    x0, x1, x2 = layer(x0, x1, x2, w0b_ref[...], w1b_ref[...], w2b_ref[...])
    x0, x1, x2 = layer(x0, x1, x2, w0c_ref[...], w1c_ref[...], w2c_ref[...])

    # layer 4: only the y1 (edge) path is consumed downstream
    s1 = jnp.concatenate([dot(x0, w4n2e_ref[...]),
                          dot(x1, w4e2e_ref[...]),
                          dot(x2, w4t2e_ref[...])], axis=0)
    y1 = (1.0 / 3.0) * _relu(dot(op1, s1))

    # head: global mean pool over |y1| -> relu(mlp1) -> softmax(mlp2)
    pooled = dot(pool_ref[...], jnp.abs(y1))
    h = _relu(dot(pooled, m1w_ref[...]) + m1b_ref[...])
    logits = dot(h, m2w_ref[...]) + m2b_ref[...]
    m = jnp.max(logits, axis=1, keepdims=True)
    e = jnp.exp(logits - m)
    out_ref[...] = e / jnp.sum(e, axis=1, keepdims=True)


# ---------------------------------------------------------------------------
# Wrapper: build static concatenations once, single pallas_call
# ---------------------------------------------------------------------------
def _cat_layer_weights(w):
    """w = (n2n, n2e, e2e, e2n, e2t, t2e, t2t), each [in, F_SIZE]."""
    n2n, n2e, e2e, e2n, e2t, t2e, t2t = w
    w0 = jnp.concatenate([n2n, n2e], axis=1)        # [din_n, 2F]
    w1 = jnp.concatenate([e2n, e2e, e2t], axis=1)   # [din_e, 3F]
    w2 = jnp.concatenate([t2e, t2t], axis=1)        # [din_t, 2F]
    return w0, w1, w2


def _cat_ops(ops):
    """ops = (L0, L1, L2, B2D3, D2B1TD1inv, D1invB1, B2TD2inv)."""
    L0, L1, L2, B2D3, D2B1, D1B1, B2T = ops
    op0 = jnp.concatenate([L0, D1B1], axis=1)         # [n0, n0+n1]
    op1 = jnp.concatenate([D2B1, L1, B2D3], axis=1)   # [n1, n0+n1+n2]
    op2 = jnp.concatenate([B2T, L2], axis=1)          # [n2, n1+n2]
    return op0, op1, op2


def flow_scconv_forward(params, X0, X1, X2, ops, pool_mat):
    op0, op1, op2 = _cat_ops(ops)
    l1w = _cat_layer_weights(params["layer1"])
    l2w = _cat_layer_weights(params["layer2"])
    l3w = _cat_layer_weights(params["layer3"])
    w4 = params["layer4"]
    l4w = (w4[1], w4[2], w4[5])   # (Wn2e, We2e, Wt2e) — only y1 path needed

    num_graphs = pool_mat.shape[0]
    n_cls = params["mlp2_w"].shape[1]
    vmem = pl.BlockSpec(memory_space=pltpu.MemorySpace.VMEM)
    n_in = 3 + 3 + 9 + 3 + 5

    return pl.pallas_call(
        fused_flow_scconv_kernel,
        out_shape=jax.ShapeDtypeStruct((num_graphs, n_cls), jnp.float32),
        in_specs=[vmem] * n_in,
        out_specs=vmem,
    )(X0, X1, X2, op0, op1, op2,
      *l1w, *l2w, *l3w, *l4w,
      pool_mat, params["mlp1_w"], params["mlp1_b"],
      params["mlp2_w"], params["mlp2_b"])


# ---------------------------------------------------------------------------
# Parameter init (weights pre-transposed [in, out]; SCConv layers bias=False)
# ---------------------------------------------------------------------------
def init_params(key, num_node_feats, num_edge_feats, num_triangle_feats,
                output_size, f_size=F_SIZE):
    def nrm(k, shape, scale=0.1):
        return (scale * jax.random.normal(k, shape)).astype(jnp.float32)

    keys = jax.random.split(key, 32)
    ki = iter(range(32))

    def layer_weights(din_n, din_e, din_t, dout):
        # order: (n2n, n2e, e2e, e2n, e2t, t2e, t2t)
        return (nrm(keys[next(ki)], (din_n, dout)),
                nrm(keys[next(ki)], (din_n, dout)),
                nrm(keys[next(ki)], (din_e, dout)),
                nrm(keys[next(ki)], (din_e, dout)),
                nrm(keys[next(ki)], (din_e, dout)),
                nrm(keys[next(ki)], (din_t, dout)),
                nrm(keys[next(ki)], (din_t, dout)))

    return {
        "layer1": layer_weights(num_node_feats, num_edge_feats,
                                num_triangle_feats, f_size),
        "layer2": layer_weights(f_size, f_size, f_size, f_size),
        "layer3": layer_weights(f_size, f_size, f_size, f_size),
        "layer4": layer_weights(f_size, f_size, f_size, f_size),
        "mlp1_w": nrm(keys[next(ki)], (f_size, f_size)),
        "mlp1_b": nrm(keys[next(ki)], (1, f_size)),
        "mlp2_w": nrm(keys[next(ki)], (f_size, output_size)),
        "mlp2_b": nrm(keys[next(ki)], (1, output_size)),
    }


# ---------------------------------------------------------------------------
# Pure-JAX reference (mirrors the PyTorch forward) for correctness check
# ---------------------------------------------------------------------------
def _ref_layer(X0, X1, X2, ops, w):
    L0, L1, L2, B2D3, D2B1, D1B1, B2T = ops
    wn2n, wn2e, we2e, we2n, we2t, wt2e, wt2t = w
    n2n = L0 @ (X0 @ wn2n)
    n2e = D2B1 @ (X0 @ wn2e)
    e2n = D1B1 @ (X1 @ we2n)
    e2e = L1 @ (X1 @ we2e)
    e2t = B2T @ (X1 @ we2t)
    t2t = L2 @ (X2 @ wt2t)
    t2e = B2D3 @ (X2 @ wt2e)
    return (0.5 * _relu(n2n + e2n),
            (1.0 / 3.0) * _relu(e2e + n2e + t2e),
            0.5 * _relu(t2t + e2t))


def _ref_forward(params, X0, X1, X2, ops, pool_mat):
    X0, X1, X2 = _ref_layer(X0, X1, X2, ops, params["layer1"])
    X0, X1, X2 = _ref_layer(X0, X1, X2, ops, params["layer2"])
    X0, X1, X2 = _ref_layer(X0, X1, X2, ops, params["layer3"])
    _, X1, _ = _ref_layer(X0, X1, X2, ops, params["layer4"])
    pooled = pool_mat @ jnp.abs(X1)
    h = _relu(pooled @ params["mlp1_w"] + params["mlp1_b"])
    return jax.nn.softmax(h @ params["mlp2_w"] + params["mlp2_b"], axis=1)


if __name__ == "__main__":
    key = jax.random.PRNGKey(0)
    k_feat, k_ops, k_par = jax.random.split(key, 3)

    # small synthetic simplicial complex: 16 nodes, 32 edges, 8 triangles
    n0, n1, n2 = 16, 32, 8
    num_node_feats = 16
    num_edge_feats = 16
    num_triangle_feats = 16
    output_size = 8  # number of classes

    kf = jax.random.split(k_feat, 3)
    X0 = jax.random.normal(kf[0], (n0, num_node_feats), dtype=jnp.float32)
    X1 = jax.random.normal(kf[1], (n1, num_edge_feats), dtype=jnp.float32)
    X2 = jax.random.normal(kf[2], (n2, num_triangle_feats), dtype=jnp.float32)

    ko = jax.random.split(k_ops, 7)
    # dense stand-ins for the sparse Laplacians / boundary operators
    L0 = 0.1 * jax.random.normal(ko[0], (n0, n0), dtype=jnp.float32)
    L1 = 0.1 * jax.random.normal(ko[1], (n1, n1), dtype=jnp.float32)
    L2 = 0.1 * jax.random.normal(ko[2], (n2, n2), dtype=jnp.float32)
    B2D3 = 0.1 * jax.random.normal(ko[3], (n1, n2), dtype=jnp.float32)
    D2B1TD1inv = 0.1 * jax.random.normal(ko[4], (n1, n0), dtype=jnp.float32)
    D1invB1 = 0.1 * jax.random.normal(ko[5], (n0, n1), dtype=jnp.float32)
    B2TD2inv = 0.1 * jax.random.normal(ko[6], (n2, n1), dtype=jnp.float32)
    ops = (L0, L1, L2, B2D3, D2B1TD1inv, D1invB1, B2TD2inv)

    # batch assignment for edges (2 graphs of 16 edges each) -> mean-pool matrix
    batch1 = jnp.concatenate([jnp.zeros(16, jnp.int32), jnp.ones(16, jnp.int32)])
    num_graphs = 2
    onehot = (batch1[None, :] == jnp.arange(num_graphs)[:, None]).astype(jnp.float32)
    counts = jnp.maximum(onehot.sum(axis=1, keepdims=True), 1.0)
    pool_mat = onehot / counts  # [num_graphs, n1], rows sum to 1 -> mean pool

    params = init_params(k_par, num_node_feats, num_edge_feats,
                         num_triangle_feats, output_size)

    out = flow_scconv_forward(params, X0, X1, X2, ops, pool_mat)
    out = jax.block_until_ready(out)

    ref = _ref_forward(params, X0, X1, X2, ops, pool_mat)
    assert out.shape == (num_graphs, output_size)
    assert jnp.allclose(out, ref, atol=1e-5, rtol=1e-5), "mismatch vs reference"
    assert jnp.allclose(out.sum(axis=1), 1.0, atol=1e-5), "softmax rows != 1"

    print("KERNEL_OK")
</pallas_src>

<mosaic_0001>
module attributes {stable_mosaic.version = 11 : i64} {
  func.func @fused_flow_scconv_kernel(%arg0: memref<16x16xf32, #tpu.memory_space<vmem>>, %arg1: memref<32x16xf32, #tpu.memory_space<vmem>>, %arg2: memref<8x16xf32, #tpu.memory_space<vmem>>, %arg3: memref<16x48xf32, #tpu.memory_space<vmem>>, %arg4: memref<32x56xf32, #tpu.memory_space<vmem>>, %arg5: memref<8x40xf32, #tpu.memory_space<vmem>>, %arg6: memref<16x64xf32, #tpu.memory_space<vmem>>, %arg7: memref<16x96xf32, #tpu.memory_space<vmem>>, %arg8: memref<16x64xf32, #tpu.memory_space<vmem>>, %arg9: memref<32x64xf32, #tpu.memory_space<vmem>>, %arg10: memref<32x96xf32, #tpu.memory_space<vmem>>, %arg11: memref<32x64xf32, #tpu.memory_space<vmem>>, %arg12: memref<32x64xf32, #tpu.memory_space<vmem>>, %arg13: memref<32x96xf32, #tpu.memory_space<vmem>>, %arg14: memref<32x64xf32, #tpu.memory_space<vmem>>, %arg15: memref<32x32xf32, #tpu.memory_space<vmem>>, %arg16: memref<32x32xf32, #tpu.memory_space<vmem>>, %arg17: memref<32x32xf32, #tpu.memory_space<vmem>>, %arg18: memref<2x32xf32, #tpu.memory_space<vmem>>, %arg19: memref<32x32xf32, #tpu.memory_space<vmem>>, %arg20: memref<1x32xf32, #tpu.memory_space<vmem>>, %arg21: memref<32x8xf32, #tpu.memory_space<vmem>>, %arg22: memref<1x8xf32, #tpu.memory_space<vmem>>, %arg23: memref<2x8xf32, #tpu.memory_space<vmem>>) attributes {dimension_semantics = [], scalar_prefetch = 0 : i64, scratch_operands = 0 : i64, tpu.core_type = #tpu.core_type<tc>} {
    %c0 = arith.constant 0 : index
    %c0_0 = arith.constant 0 : index
    %0 = vector.load %arg3[%c0, %c0_0] : memref<16x48xf32, #tpu.memory_space<vmem>>, vector<16x48xf32>
    %c0_1 = arith.constant 0 : index
    %c0_2 = arith.constant 0 : index
    %1 = vector.load %arg4[%c0_1, %c0_2] : memref<32x56xf32, #tpu.memory_space<vmem>>, vector<32x56xf32>
    %c0_3 = arith.constant 0 : index
    %c0_4 = arith.constant 0 : index
    %2 = vector.load %arg5[%c0_3, %c0_4] : memref<8x40xf32, #tpu.memory_space<vmem>>, vector<8x40xf32>
    %c0_5 = arith.constant 0 : index
    %c0_6 = arith.constant 0 : index
    %3 = vector.load %arg0[%c0_5, %c0_6] : memref<16x16xf32, #tpu.memory_space<vmem>>, vector<16x16xf32>
    %c0_7 = arith.constant 0 : index
    %c0_8 = arith.constant 0 : index
    %4 = vector.load %arg1[%c0_7, %c0_8] : memref<32x16xf32, #tpu.memory_space<vmem>>, vector<32x16xf32>
    %c0_9 = arith.constant 0 : index
    %c0_10 = arith.constant 0 : index
    %5 = vector.load %arg2[%c0_9, %c0_10] : memref<8x16xf32, #tpu.memory_space<vmem>>, vector<8x16xf32>
    %c0_11 = arith.constant 0 : index
    %c0_12 = arith.constant 0 : index
    %6 = vector.load %arg6[%c0_11, %c0_12] : memref<16x64xf32, #tpu.memory_space<vmem>>, vector<16x64xf32>
    %c0_13 = arith.constant 0 : index
    %c0_14 = arith.constant 0 : index
    %7 = vector.load %arg7[%c0_13, %c0_14] : memref<16x96xf32, #tpu.memory_space<vmem>>, vector<16x96xf32>
    %c0_15 = arith.constant 0 : index
    %c0_16 = arith.constant 0 : index
    %8 = vector.load %arg8[%c0_15, %c0_16] : memref<16x64xf32, #tpu.memory_space<vmem>>, vector<16x64xf32>
    %cst = arith.constant dense<0.000000e+00> : vector<16x64xf32>
    %9 = tpu.matmul %3, %6, %cst {dimension_numbers = #tpu.dot_dimension_numbers<[1], [0], [0], [1], [0, 0, 1, 1], [], []>} : vector<16x16xf32>, vector<16x64xf32>, vector<16x64xf32> -> vector<16x64xf32>
    %cst_17 = arith.constant dense<0.000000e+00> : vector<32x96xf32>
    %10 = tpu.matmul %4, %7, %cst_17 {dimension_numbers = #tpu.dot_dimension_numbers<[1], [0], [0], [1], [0, 0, 1, 1], [], []>} : vector<32x16xf32>, vector<16x96xf32>, vector<32x96xf32> -> vector<32x96xf32>
    %cst_18 = arith.constant dense<0.000000e+00> : vector<8x64xf32>
    %11 = tpu.matmul %5, %8, %cst_18 {dimension_numbers = #tpu.dot_dimension_numbers<[1], [0], [0], [1], [0, 0, 1, 1], [], []>} : vector<8x16xf32>, vector<16x64xf32>, vector<8x64xf32> -> vector<8x64xf32>
    %12 = vector.extract_strided_slice %9 {offsets = [0, 0], sizes = [16, 32], strides = [1, 1]} : vector<16x64xf32> to vector<16x32xf32>
    %13 = vector.extract_strided_slice %10 {offsets = [0, 0], sizes = [32, 32], strides = [1, 1]} : vector<32x96xf32> to vector<32x32xf32>
    %14 = tpu.concatenate %12, %13 in 0 : vector<16x32xf32>, vector<32x32xf32> -> vector<48x32xf32>
    %15 = vector.extract_strided_slice %9 {offsets = [0, 32], sizes = [16, 32], strides = [1, 1]} : vector<16x64xf32> to vector<16x32xf32>
    %16 = vector.extract_strided_slice %10 {offsets = [0, 32], sizes = [32, 32], strides = [1, 1]} : vector<32x96xf32> to vector<32x32xf32>
    %17 = vector.extract_strided_slice %11 {offsets = [0, 0], sizes = [8, 32], strides = [1, 1]} : vector<8x64xf32> to vector<8x32xf32>
    %18 = tpu.concatenate %15, %16, %17 in 0 : vector<16x32xf32>, vector<32x32xf32>, vector<8x32xf32> -> vector<56x32xf32>
    %19 = vector.extract_strided_slice %10 {offsets = [0, 64], sizes = [32, 32], strides = [1, 1]} : vector<32x96xf32> to vector<32x32xf32>
    %20 = vector.extract_strided_slice %11 {offsets = [0, 32], sizes = [8, 32], strides = [1, 1]} : vector<8x64xf32> to vector<8x32xf32>
    %21 = tpu.concatenate %19, %20 in 0 : vector<32x32xf32>, vector<8x32xf32> -> vector<40x32xf32>
    %cst_19 = arith.constant dense<0.000000e+00> : vector<16x32xf32>
    %22 = tpu.matmul %0, %14, %cst_19 {dimension_numbers = #tpu.dot_dimension_numbers<[1], [0], [0], [1], [0, 0, 1, 1], [], []>} : vector<16x48xf32>, vector<48x32xf32>, vector<16x32xf32> -> vector<16x32xf32>
    %cst_20 = arith.constant 0.000000e+00 : f32
    %23 = vector.broadcast %cst_20 : f32 to vector<16x32xf32>
    %24 = arith.maximumf %22, %23 : vector<16x32xf32>
    %cst_21 = arith.constant 5.000000e-01 : f32
    %25 = vector.broadcast %cst_21 : f32 to vector<16x32xf32>
    %26 = arith.mulf %25, %24 : vector<16x32xf32>
    %cst_22 = arith.constant dense<0.000000e+00> : vector<32x32xf32>
    %27 = tpu.matmul %1, %18, %cst_22 {dimension_numbers = #tpu.dot_dimension_numbers<[1], [0], [0], [1], [0, 0, 1, 1], [], []>} : vector<32x56xf32>, vector<56x32xf32>, vector<32x32xf32> -> vector<32x32xf32>
    %cst_23 = arith.constant 0.000000e+00 : f32
    %28 = vector.broadcast %cst_23 : f32 to vector<32x32xf32>
    %29 = arith.maximumf %27, %28 : vector<32x32xf32>
    %cst_24 = arith.constant 0.333333343 : f32
    %30 = vector.broadcast %cst_24 : f32 to vector<32x32xf32>
    %31 = arith.mulf %30, %29 : vector<32x32xf32>
    %cst_25 = arith.constant dense<0.000000e+00> : vector<8x32xf32>
    %32 = tpu.matmul %2, %21, %cst_25 {dimension_numbers = #tpu.dot_dimension_numbers<[1], [0], [0], [1], [0, 0, 1, 1], [], []>} : vector<8x40xf32>, vector<40x32xf32>, vector<8x32xf32> -> vector<8x32xf32>
    %cst_26 = arith.constant 0.000000e+00 : f32
    %33 = vector.broadcast %cst_26 : f32 to vector<8x32xf32>
    %34 = arith.maximumf %32, %33 : vector<8x32xf32>
    %cst_27 = arith.constant 5.000000e-01 : f32
    %35 = vector.broadcast %cst_27 : f32 to vector<8x32xf32>
    %36 = arith.mulf %35, %34 : vector<8x32xf32>
    %c0_28 = arith.constant 0 : index
    %c0_29 = arith.constant 0 : index
    %37 = vector.load %arg9[%c0_28, %c0_29] : memref<32x64xf32, #tpu.memory_space<vmem>>, vector<32x64xf32>
    %c0_30 = arith.constant 0 : index
    %c0_31 = arith.constant 0 : index
    %38 = vector.load %arg10[%c0_30, %c0_31] : memref<32x96xf32, #tpu.memory_space<vmem>>, vector<32x96xf32>
    %c0_32 = arith.constant 0 : index
    %c0_33 = arith.constant 0 : index
    %39 = vector.load %arg11[%c0_32, %c0_33] : memref<32x64xf32, #tpu.memory_space<vmem>>, vector<32x64xf32>
    %cst_34 = arith.constant dense<0.000000e+00> : vector<16x64xf32>
    %40 = tpu.matmul %26, %37, %cst_34 {dimension_numbers = #tpu.dot_dimension_numbers<[1], [0], [0], [1], [0, 0, 1, 1], [], []>} : vector<16x32xf32>, vector<32x64xf32>, vector<16x64xf32> -> vector<16x64xf32>
    %cst_35 = arith.constant dense<0.000000e+00> : vector<32x96xf32>
    %41 = tpu.matmul %31, %38, %cst_35 {dimension_numbers = #tpu.dot_dimension_numbers<[1], [0], [0], [1], [0, 0, 1, 1], [], []>} : vector<32x32xf32>, vector<32x96xf32>, vector<32x96xf32> -> vector<32x96xf32>
    %cst_36 = arith.constant dense<0.000000e+00> : vector<8x64xf32>
    %42 = tpu.matmul %36, %39, %cst_36 {dimension_numbers = #tpu.dot_dimension_numbers<[1], [0], [0], [1], [0, 0, 1, 1], [], []>} : vector<8x32xf32>, vector<32x64xf32>, vector<8x64xf32> -> vector<8x64xf32>
    %43 = vector.extract_strided_slice %40 {offsets = [0, 0], sizes = [16, 32], strides = [1, 1]} : vector<16x64xf32> to vector<16x32xf32>
    %44 = vector.extract_strided_slice %41 {offsets = [0, 0], sizes = [32, 32], strides = [1, 1]} : vector<32x96xf32> to vector<32x32xf32>
    %45 = tpu.concatenate %43, %44 in 0 : vector<16x32xf32>, vector<32x32xf32> -> vector<48x32xf32>
    %46 = vector.extract_strided_slice %40 {offsets = [0, 32], sizes = [16, 32], strides = [1, 1]} : vector<16x64xf32> to vector<16x32xf32>
    %47 = vector.extract_strided_slice %41 {offsets = [0, 32], sizes = [32, 32], strides = [1, 1]} : vector<32x96xf32> to vector<32x32xf32>
    %48 = vector.extract_strided_slice %42 {offsets = [0, 0], sizes = [8, 32], strides = [1, 1]} : vector<8x64xf32> to vector<8x32xf32>
    %49 = tpu.concatenate %46, %47, %48 in 0 : vector<16x32xf32>, vector<32x32xf32>, vector<8x32xf32> -> vector<56x32xf32>
    %50 = vector.extract_strided_slice %41 {offsets = [0, 64], sizes = [32, 32], strides = [1, 1]} : vector<32x96xf32> to vector<32x32xf32>
    %51 = vector.extract_strided_slice %42 {offsets = [0, 32], sizes = [8, 32], strides = [1, 1]} : vector<8x64xf32> to vector<8x32xf32>
    %52 = tpu.concatenate %50, %51 in 0 : vector<32x32xf32>, vector<8x32xf32> -> vector<40x32xf32>
    %cst_37 = arith.constant dense<0.000000e+00> : vector<16x32xf32>
    %53 = tpu.matmul %0, %45, %cst_37 {dimension_numbers = #tpu.dot_dimension_numbers<[1], [0], [0], [1], [0, 0, 1, 1], [], []>} : vector<16x48xf32>, vector<48x32xf32>, vector<16x32xf32> -> vector<16x32xf32>
    %cst_38 = arith.constant 0.000000e+00 : f32
    %54 = vector.broadcast %cst_38 : f32 to vector<16x32xf32>
    %55 = arith.maximumf %53, %54 : vector<16x32xf32>
    %cst_39 = arith.constant 5.000000e-01 : f32
    %56 = vector.broadcast %cst_39 : f32 to vector<16x32xf32>
    %57 = arith.mulf %56, %55 : vector<16x32xf32>
    %cst_40 = arith.constant dense<0.000000e+00> : vector<32x32xf32>
    %58 = tpu.matmul %1, %49, %cst_40 {dimension_numbers = #tpu.dot_dimension_numbers<[1], [0], [0], [1], [0, 0, 1, 1], [], []>} : vector<32x56xf32>, vector<56x32xf32>, vector<32x32xf32> -> vector<32x32xf32>
    %cst_41 = arith.constant 0.000000e+00 : f32
    %59 = vector.broadcast %cst_41 : f32 to vector<32x32xf32>
    %60 = arith.maximumf %58, %59 : vector<32x32xf32>
    %cst_42 = arith.constant 0.333333343 : f32
    %61 = vector.broadcast %cst_42 : f32 to vector<32x32xf32>
    %62 = arith.mulf %61, %60 : vector<32x32xf32>
    %cst_43 = arith.constant dense<0.000000e+00> : vector<8x32xf32>
    %63 = tpu.matmul %2, %52, %cst_43 {dimension_numbers = #tpu.dot_dimension_numbers<[1], [0], [0], [1], [0, 0, 1, 1], [], []>} : vector<8x40xf32>, vector<40x32xf32>, vector<8x32xf32> -> vector<8x32xf32>
    %cst_44 = arith.constant 0.000000e+00 : f32
    %64 = vector.broadcast %cst_44 : f32 to vector<8x32xf32>
    %65 = arith.maximumf %63, %64 : vector<8x32xf32>
    %cst_45 = arith.constant 5.000000e-01 : f32
    %66 = vector.broadcast %cst_45 : f32 to vector<8x32xf32>
    %67 = arith.mulf %66, %65 : vector<8x32xf32>
    %c0_46 = arith.constant 0 : index
    %c0_47 = arith.constant 0 : index
    %68 = vector.load %arg12[%c0_46, %c0_47] : memref<32x64xf32, #tpu.memory_space<vmem>>, vector<32x64xf32>
    %c0_48 = arith.constant 0 : index
    %c0_49 = arith.constant 0 : index
    %69 = vector.load %arg13[%c0_48, %c0_49] : memref<32x96xf32, #tpu.memory_space<vmem>>, vector<32x96xf32>
    %c0_50 = arith.constant 0 : index
    %c0_51 = arith.constant 0 : index
    %70 = vector.load %arg14[%c0_50, %c0_51] : memref<32x64xf32, #tpu.memory_space<vmem>>, vector<32x64xf32>
    %cst_52 = arith.constant dense<0.000000e+00> : vector<16x64xf32>
    %71 = tpu.matmul %57, %68, %cst_52 {dimension_numbers = #tpu.dot_dimension_numbers<[1], [0], [0], [1], [0, 0, 1, 1], [], []>} : vector<16x32xf32>, vector<32x64xf32>, vector<16x64xf32> -> vector<16x64xf32>
    %cst_53 = arith.constant dense<0.000000e+00> : vector<32x96xf32>
    %72 = tpu.matmul %62, %69, %cst_53 {dimension_numbers = #tpu.dot_dimension_numbers<[1], [0], [0], [1], [0, 0, 1, 1], [], []>} : vector<32x32xf32>, vector<32x96xf32>, vector<32x96xf32> -> vector<32x96xf32>
    %cst_54 = arith.constant dense<0.000000e+00> : vector<8x64xf32>
    %73 = tpu.matmul %67, %70, %cst_54 {dimension_numbers = #tpu.dot_dimension_numbers<[1], [0], [0], [1], [0, 0, 1, 1], [], []>} : vector<8x32xf32>, vector<32x64xf32>, vector<8x64xf32> -> vector<8x64xf32>
    %74 = vector.extract_strided_slice %71 {offsets = [0, 0], sizes = [16, 32], strides = [1, 1]} : vector<16x64xf32> to vector<16x32xf32>
    %75 = vector.extract_strided_slice %72 {offsets = [0, 0], sizes = [32, 32], strides = [1, 1]} : vector<32x96xf32> to vector<32x32xf32>
    %76 = tpu.concatenate %74, %75 in 0 : vector<16x32xf32>, vector<32x32xf32> -> vector<48x32xf32>
    %77 = vector.extract_strided_slice %71 {offsets = [0, 32], sizes = [16, 32], strides = [1, 1]} : vector<16x64xf32> to vector<16x32xf32>
    %78 = vector.extract_strided_slice %72 {offsets = [0, 32], sizes = [32, 32], strides = [1, 1]} : vector<32x96xf32> to vector<32x32xf32>
    %79 = vector.extract_strided_slice %73 {offsets = [0, 0], sizes = [8, 32], strides = [1, 1]} : vector<8x64xf32> to vector<8x32xf32>
    %80 = tpu.concatenate %77, %78, %79 in 0 : vector<16x32xf32>, vector<32x32xf32>, vector<8x32xf32> -> vector<56x32xf32>
    %81 = vector.extract_strided_slice %72 {offsets = [0, 64], sizes = [32, 32], strides = [1, 1]} : vector<32x96xf32> to vector<32x32xf32>
    %82 = vector.extract_strided_slice %73 {offsets = [0, 32], sizes = [8, 32], strides = [1, 1]} : vector<8x64xf32> to vector<8x32xf32>
    %83 = tpu.concatenate %81, %82 in 0 : vector<32x32xf32>, vector<8x32xf32> -> vector<40x32xf32>
    %cst_55 = arith.constant dense<0.000000e+00> : vector<16x32xf32>
    %84 = tpu.matmul %0, %76, %cst_55 {dimension_numbers = #tpu.dot_dimension_numbers<[1], [0], [0], [1], [0, 0, 1, 1], [], []>} : vector<16x48xf32>, vector<48x32xf32>, vector<16x32xf32> -> vector<16x32xf32>
    %cst_56 = arith.constant 0.000000e+00 : f32
    %85 = vector.broadcast %cst_56 : f32 to vector<16x32xf32>
    %86 = arith.maximumf %84, %85 : vector<16x32xf32>
    %cst_57 = arith.constant 5.000000e-01 : f32
    %87 = vector.broadcast %cst_57 : f32 to vector<16x32xf32>
    %88 = arith.mulf %87, %86 : vector<16x32xf32>
    %cst_58 = arith.constant dense<0.000000e+00> : vector<32x32xf32>
    %89 = tpu.matmul %1, %80, %cst_58 {dimension_numbers = #tpu.dot_dimension_numbers<[1], [0], [0], [1], [0, 0, 1, 1], [], []>} : vector<32x56xf32>, vector<56x32xf32>, vector<32x32xf32> -> vector<32x32xf32>
    %cst_59 = arith.constant 0.000000e+00 : f32
    %90 = vector.broadcast %cst_59 : f32 to vector<32x32xf32>
    %91 = arith.maximumf %89, %90 : vector<32x32xf32>
    %cst_60 = arith.constant 0.333333343 : f32
    %92 = vector.broadcast %cst_60 : f32 to vector<32x32xf32>
    %93 = arith.mulf %92, %91 : vector<32x32xf32>
    %cst_61 = arith.constant dense<0.000000e+00> : vector<8x32xf32>
    %94 = tpu.matmul %2, %83, %cst_61 {dimension_numbers = #tpu.dot_dimension_numbers<[1], [0], [0], [1], [0, 0, 1, 1], [], []>} : vector<8x40xf32>, vector<40x32xf32>, vector<8x32xf32> -> vector<8x32xf32>
    %cst_62 = arith.constant 0.000000e+00 : f32
    %95 = vector.broadcast %cst_62 : f32 to vector<8x32xf32>
    %96 = arith.maximumf %94, %95 : vector<8x32xf32>
    %cst_63 = arith.constant 5.000000e-01 : f32
    %97 = vector.broadcast %cst_63 : f32 to vector<8x32xf32>
    %98 = arith.mulf %97, %96 : vector<8x32xf32>
    %c0_64 = arith.constant 0 : index
    %c0_65 = arith.constant 0 : index
    %99 = vector.load %arg15[%c0_64, %c0_65] : memref<32x32xf32, #tpu.memory_space<vmem>>, vector<32x32xf32>
    %cst_66 = arith.constant dense<0.000000e+00> : vector<16x32xf32>
    %100 = tpu.matmul %88, %99, %cst_66 {dimension_numbers = #tpu.dot_dimension_numbers<[1], [0], [0], [1], [0, 0, 1, 1], [], []>} : vector<16x32xf32>, vector<32x32xf32>, vector<16x32xf32> -> vector<16x32xf32>
    %c0_67 = arith.constant 0 : index
    %c0_68 = arith.constant 0 : index
    %101 = vector.load %arg16[%c0_67, %c0_68] : memref<32x32xf32, #tpu.memory_space<vmem>>, vector<32x32xf32>
    %cst_69 = arith.constant dense<0.000000e+00> : vector<32x32xf32>
    %102 = tpu.matmul %93, %101, %cst_69 {dimension_numbers = #tpu.dot_dimension_numbers<[1], [0], [0], [1], [0, 0, 1, 1], [], []>} : vector<32x32xf32>, vector<32x32xf32>, vector<32x32xf32> -> vector<32x32xf32>
    %c0_70 = arith.constant 0 : index
    %c0_71 = arith.constant 0 : index
    %103 = vector.load %arg17[%c0_70, %c0_71] : memref<32x32xf32, #tpu.memory_space<vmem>>, vector<32x32xf32>
    %cst_72 = arith.constant dense<0.000000e+00> : vector<8x32xf32>
    %104 = tpu.matmul %98, %103, %cst_72 {dimension_numbers = #tpu.dot_dimension_numbers<[1], [0], [0], [1], [0, 0, 1, 1], [], []>} : vector<8x32xf32>, vector<32x32xf32>, vector<8x32xf32> -> vector<8x32xf32>
    %105 = tpu.concatenate %100, %102, %104 in 0 : vector<16x32xf32>, vector<32x32xf32>, vector<8x32xf32> -> vector<56x32xf32>
    %cst_73 = arith.constant dense<0.000000e+00> : vector<32x32xf32>
    %106 = tpu.matmul %1, %105, %cst_73 {dimension_numbers = #tpu.dot_dimension_numbers<[1], [0], [0], [1], [0, 0, 1, 1], [], []>} : vector<32x56xf32>, vector<56x32xf32>, vector<32x32xf32> -> vector<32x32xf32>
    %cst_74 = arith.constant 0.000000e+00 : f32
    %107 = vector.broadcast %cst_74 : f32 to vector<32x32xf32>
    %108 = arith.maximumf %106, %107 : vector<32x32xf32>
    %cst_75 = arith.constant 0.333333343 : f32
    %109 = vector.broadcast %cst_75 : f32 to vector<32x32xf32>
    %110 = arith.mulf %109, %108 : vector<32x32xf32>
    %c0_76 = arith.constant 0 : index
    %c0_77 = arith.constant 0 : index
    %111 = vector.load %arg18[%c0_76, %c0_77] : memref<2x32xf32, #tpu.memory_space<vmem>>, vector<2x32xf32>
    %112 = math.absf %110 : vector<32x32xf32>
    %cst_78 = arith.constant dense<0.000000e+00> : vector<2x32xf32>
    %113 = tpu.matmul %111, %112, %cst_78 {dimension_numbers = #tpu.dot_dimension_numbers<[1], [0], [0], [1], [0, 0, 1, 1], [], []>} : vector<2x32xf32>, vector<32x32xf32>, vector<2x32xf32> -> vector<2x32xf32>
    %c0_79 = arith.constant 0 : index
    %c0_80 = arith.constant 0 : index
    %114 = vector.load %arg19[%c0_79, %c0_80] : memref<32x32xf32, #tpu.memory_space<vmem>>, vector<32x32xf32>
    %cst_81 = arith.constant dense<0.000000e+00> : vector<2x32xf32>
    %115 = tpu.matmul %113, %114, %cst_81 {dimension_numbers = #tpu.dot_dimension_numbers<[1], [0], [0], [1], [0, 0, 1, 1], [], []>} : vector<2x32xf32>, vector<32x32xf32>, vector<2x32xf32> -> vector<2x32xf32>
    %c0_82 = arith.constant 0 : index
    %c0_83 = arith.constant 0 : index
    %116 = vector.load %arg20[%c0_82, %c0_83] : memref<1x32xf32, #tpu.memory_space<vmem>>, vector<1x32xf32>
    %117 = vector.broadcast %116 : vector<1x32xf32> to vector<2x32xf32>
    %118 = arith.addf %115, %117 : vector<2x32xf32>
    %cst_84 = arith.constant 0.000000e+00 : f32
    %119 = vector.broadcast %cst_84 : f32 to vector<2x32xf32>
    %120 = arith.maximumf %118, %119 : vector<2x32xf32>
    %c0_85 = arith.constant 0 : index
    %c0_86 = arith.constant 0 : index
    %121 = vector.load %arg21[%c0_85, %c0_86] : memref<32x8xf32, #tpu.memory_space<vmem>>, vector<32x8xf32>
    %cst_87 = arith.constant dense<0.000000e+00> : vector<2x8xf32>
    %122 = tpu.matmul %120, %121, %cst_87 {dimension_numbers = #tpu.dot_dimension_numbers<[1], [0], [0], [1], [0, 0, 1, 1], [], []>} : vector<2x32xf32>, vector<32x8xf32>, vector<2x8xf32> -> vector<2x8xf32>
    %c0_88 = arith.constant 0 : index
    %c0_89 = arith.constant 0 : index
    %123 = vector.load %arg22[%c0_88, %c0_89] : memref<1x8xf32, #tpu.memory_space<vmem>>, vector<1x8xf32>
    %124 = vector.broadcast %123 : vector<1x8xf32> to vector<2x8xf32>
    %125 = arith.addf %122, %124 : vector<2x8xf32>
    %cst_90 = arith.constant dense<0xFF800000> : vector<2xf32>
    %126 = vector.multi_reduction <maximumf>, %125, %cst_90 [1] : vector<2x8xf32> to vector<2xf32>
    %127 = vector.shape_cast %126 : vector<2xf32> to vector<2x1xf32>
    %128 = vector.broadcast %127 : vector<2x1xf32> to vector<2x8xf32>
    %129 = arith.subf %125, %128 : vector<2x8xf32>
    %130 = math.exp %129 : vector<2x8xf32>
    %cst_91 = arith.constant dense<0.000000e+00> : vector<2xf32>
    %131 = vector.multi_reduction <add>, %130, %cst_91 [1] : vector<2x8xf32> to vector<2xf32>
    %132 = vector.shape_cast %131 : vector<2xf32> to vector<2x1xf32>
    %133 = vector.broadcast %132 : vector<2x1xf32> to vector<2x8xf32>
    %134 = arith.divf %130, %133 : vector<2x8xf32>
    %c0_92 = arith.constant 0 : index
    %c0_93 = arith.constant 0 : index
    %135 = vector.load %arg23[%c0_92, %c0_93] : memref<2x8xf32, #tpu.memory_space<vmem>>, vector<2x8xf32>
    tpu.vector_store %arg23[%c0_92, %c0_93], %134 {strides = array<i32>} : memref<2x8xf32, #tpu.memory_space<vmem>>, vector<2x8xf32>,
    return
  }
}

</mosaic_0001>

<bundles_post_ra>
// kernel: tpu_custom_call.1
= control target key start
LH: loop header
LB: loop body
LE: loop exit
PB: predicated region body
PF: predicated region fallthrough
CT: control target
= control target key end

     0   :  { %s4440_s0 = inlined_call_operand.hbm [shape: f32[16,16], index: 0, kind: input, shape index: {}]   ;;  %s4441_s1 = inlined_call_operand.vmem [shape: f32[32,16], index: 1, kind: input, shape index: {}]   ;;  %s4442_s2 = inlined_call_operand.hbm [shape: f32[8,16], index: 2, kind: input, shape index: {}]   ;;  %s4443_s3 = inlined_call_operand.hbm [shape: f32[16,48], index: 3, kind: input, shape index: {}]   ;;  %s4444_s4 = inlined_call_operand.vmem [shape: f32[32,56], index: 4, kind: input, shape index: {}]   ;;  %s4445_s5 = inlined_call_operand.hbm [shape: f32[8,40], index: 5, kind: input, shape index: {}]   ;;  %s4446_s6 = inlined_call_operand.hbm [shape: f32[16,64], index: 6, kind: input, shape index: {}]   ;;  %s4447_s7 = inlined_call_operand.hbm [shape: f32[16,96], index: 7, kind: input, shape index: {}]   ;;  %s4448_s8 = inlined_call_operand.hbm [shape: f32[16,64], index: 8, kind: input, shape index: {}]   ;;  %s4449_s9 = inlined_call_operand.vmem [shape: f32[32,64], index: 9, kind: input, shape index: {}]   ;;  %s4450_s10 = inlined_call_operand.vmem [shape: f32[32,96], index: 10, kind: input, shape index: {}]   ;;  %s4451_s11 = inlined_call_operand.vmem [shape: f32[32,64], index: 11, kind: input, shape index: {}]   ;;  %s4452_s12 = inlined_call_operand.hbm [shape: f32[32,64], index: 12, kind: input, shape index: {}]   ;;  %s4453_s13 = inlined_call_operand.hbm [shape: f32[32,96], index: 13, kind: input, shape index: {}]   ;;  %s4454_s14 = inlined_call_operand.hbm [shape: f32[32,64], index: 14, kind: input, shape index: {}]   ;;  %s4455_s15 = inlined_call_operand.hbm [shape: f32[32,32], index: 15, kind: input, shape index: {}]   ;;  %s4456_s16 = inlined_call_operand.hbm [shape: f32[32,32], index: 16, kind: input, shape index: {}]   ;;  %s4457_s17 = inlined_call_operand.hbm [shape: f32[32,32], index: 17, kind: input, shape index: {}]   ;;  %s4458_s18 = inlined_call_operand.vmem [shape: f32[2,32], index: 18, kind: input, shape index: {}]   ;;  %s4459_s19 = inlined_call_operand.hbm [shape: f32[32,32], index: 19, kind: input, shape index: {}]   ;;  %s4460_s20 = inlined_call_operand.vmem [shape: f32[1,32], index: 20, kind: input, shape index: {}]   ;;  %s4461_s21 = inlined_call_operand.vmem [shape: f32[32,8], index: 21, kind: input, shape index: {}]   ;;  %s4462_s22 = inlined_call_operand.vmem [shape: f32[1,8], index: 22, kind: input, shape index: {}]   ;;  %s4463_s23 = inlined_call_operand.hbm [shape: f32[2,8], index: 23, kind: output, shape index: {}]  }
   0x1   :  { %4473 = sst [smem:[#allocation35_spill]] %s4440_s0 }
   0x2   :  { %4474 = sst [smem:[#allocation36_spill]] %s4441_s1 }
   0x3   :  { %4475 = sst [smem:[#allocation37_spill]] %s4442_s2 }
   0x4   :  { %4476 = sst [smem:[#allocation38_spill]] %s4443_s3 }
   0x5   :  { %4477 = sst [smem:[#allocation39_spill]] %s4444_s4 }
   0x6   :  { %4478 = sst [smem:[#allocation40_spill]] %s4445_s5 }
   0x7   :  { %4479 = sst [smem:[#allocation41_spill]] %s4446_s6 }
   0x8   :  { %4480 = sst [smem:[#allocation42_spill]] %s4447_s7 }
   0x9   :  { %4481 = sst [smem:[#allocation43_spill]] %s4463_s23 }
   0xa   :  { %28 = vsyncpa [#allocation3], 0 }
   0xb   :  { %29 = vsyncpa [#allocation6], 0 }
   0xc   :  { %30 = vsyncpa [#allocation9], 0 }
   0xd   :  { %31 = vsyncpa [#allocation12], 0 }
   0xe   :  { %32 = vsyncpa [#allocation15], 0 }
   0xf   :  { %33 = vsyncpa [#allocation18], 0 }
  0x10   :  { %34 = vsyncpa [#allocation21], 0 }
  0x11   :  { %35 = vsyncpa [#allocation24], 0 }
  0x12   :  { %36 = vsyncpa [#allocation4], 0  ;;  %s3794_s4 = smov [#allocation5]   ;;  %s3795_s24 = smov [#allocation8]  }
  0x13   :  { %s57_s30 = sshll.u32 %s3794_s4, 4  ;;  %s81_s25 = sshll.u32 %s3795_s24, 4  ;;  %s58_s30 = int_to_ptr.vmem [resolvable:$true] %s57_s30  ;;  %s82_s25 = int_to_ptr.vmem [resolvable:$true] %s81_s25 }
  0x14   :  { %s4482_s26 = sld [smem:[#allocation37_spill]] }
  0x1a   :  { %s3446_s2 = scalar_lea.hbm %s4482_s26, 128 }
  0x1b   :  { %p3447_p0 = scmp.ne.s32.totalorder %s4482_s26, %s3446_s2  ;;  %p3450_p1 = scmp.lt.u32.totalorder %s3446_s2, %s4482_s26 }
  0x1d   :  { %p3452_p2 = pnand %p3450_p1, %p3447_p0 }
  0x1f   :  { %3455 = shalt.err (!%p3452_p2)
}
  0x20   :  { %s3456_s29 = scalar_lea.vmem %s58_s30, 128  ;;  %p3461_p4 = scmp.lt.s32.totalorder %s58_s30, %s58_s30 }
  0x21   :  { %p3457_p3 = scmp.ne.s32.totalorder %s58_s30, %s3456_s29  ;;  %p3462_p5 = scmp.lt.s32.totalorder %s3456_s29, %s3456_s29 }
  0x23   :  { %p3463_p6 = por %p3462_p5, %p3461_p4 }
  0x25   :  { %p3464_p7 = pnand %p3463_p6, %p3457_p3 }
  0x27   :  { %3467 = shalt.err (!%p3464_p7)
}
  0x28   :  { %60 = dma.hbm_to_vmem [thread:$0]  %s4482_s26, 128, %s58_s30, [#allocation6]  }
  0x29   :  { %s4483_s5 = sld [smem:[#allocation40_spill]] }
  0x2f   :  { %s3468_s1 = scalar_lea.hbm %s4483_s5, 128 }
  0x30   :  { %p3469_p8 = scmp.ne.s32.totalorder %s4483_s5, %s3468_s1  ;;  %p3472_p9 = scmp.lt.u32.totalorder %s3468_s1, %s4483_s5 }
  0x32   :  { %p3474_p10 = pnand %p3472_p9, %p3469_p8 }
  0x34   :  { %3477 = shalt.err (!%p3474_p10)
}
  0x35   :  { %s3478_s28 = scalar_lea.vmem %s82_s25, 128  ;;  %p3483_p12 = scmp.lt.s32.totalorder %s82_s25, %s82_s25 }
  0x36   :  { %p3479_p11 = scmp.ne.s32.totalorder %s82_s25, %s3478_s28  ;;  %p3484_p13 = scmp.lt.s32.totalorder %s3478_s28, %s3478_s28 }
  0x38   :  { %p3485_p0 = por %p3484_p13, %p3483_p12 }
  0x3a   :  { %p3486_p1 = pnand %p3485_p0, %p3479_p11 }
  0x3c   :  { %3489 = shalt.err (!%p3486_p1)
}
  0x3d   :  { %84 = dma.hbm_to_vmem [thread:$0]  %s4483_s5, 128, %s82_s25, [#allocation9]  }
  0x3e   :  { %s3796_s29 = smov [#allocation11]   ;;  %s3797_s0 = smov [#allocation14]  }
  0x3f   :  { %s102_s3 = sshll.u32 %s3796_s29, 4  ;;  %s132_s4 = sshll.u32 %s3797_s0, 4  ;;  %s103_s3 = int_to_ptr.vmem [resolvable:$true] %s102_s3  ;;  %s3961_s4 = int_to_ptr.vmem [resolvable:$true] %s132_s4 }
  0x40   :  { %s4484_s6 = sld [smem:[#allocation42_spill]] }
  0x46   :  { %s3490_s27 = scalar_lea.hbm %s4484_s6, 256 }
  0x47   :  { %p3491_p2 = scmp.ne.s32.totalorder %s4484_s6, %s3490_s27  ;;  %p3494_p3 = scmp.lt.u32.totalorder %s3490_s27, %s4484_s6 }
  0x49   :  { %p3496_p4 = pnand %p3494_p3, %p3491_p2 }
  0x4b   :  { %3499 = shalt.err (!%p3496_p4)
}
  0x4c   :  { %s3500_s25 = scalar_lea.vmem %s103_s3, 256  ;;  %p3505_p6 = scmp.lt.s32.totalorder %s103_s3, %s103_s3 }
  0x4d   :  { %p3501_p5 = scmp.ne.s32.totalorder %s103_s3, %s3500_s25  ;;  %p3506_p7 = scmp.lt.s32.totalorder %s3500_s25, %s3500_s25 }
  0x4f   :  { %p3507_p8 = por %p3506_p7, %p3505_p6 }
  0x51   :  { %p3508_p9 = pnand %p3507_p8, %p3501_p5 }
  0x53   :  { %3511 = shalt.err (!%p3508_p9)
}
  0x54   :  { %s3798_s5 = smov 128   ;;  %s3799_s30 = smov 8  }
  0x55   :  { %108 = dma.hbm_to_vmem [thread:$0]  %s4484_s6, 256, %s103_s3, [#allocation12], %s3798_s5, %s3798_s5, %s3799_s30  }
  0x56   :  { %s3512_s24 = scalar_lea.hbm %s4452_s12, 512 }
  0x57   :  { %p3513_p10 = scmp.ne.s32.totalorder %s4452_s12, %s3512_s24  ;;  %p3516_p11 = scmp.lt.u32.totalorder %s3512_s24, %s4452_s12 }
  0x59   :  { %p3518_p12 = pnand %p3516_p11, %p3513_p10 }
  0x5b   :  { %3521 = shalt.err (!%p3518_p12)
}
  0x5c   :  { %s3522_s28 = scalar_lea.vmem %s3961_s4, 512  ;;  %p3527_p0 = scmp.lt.s32.totalorder %s3961_s4, %s3961_s4 }
  0x5d   :  { %p3523_p13 = scmp.ne.s32.totalorder %s3961_s4, %s3522_s28  ;;  %p3528_p1 = scmp.lt.s32.totalorder %s3522_s28, %s3522_s28 }
  0x5f   :  { %p3529_p2 = por %p3528_p1, %p3527_p0 }
  0x61   :  { %p3530_p3 = pnand %p3529_p2, %p3523_p13 }
  0x63   :  { %3533 = shalt.err (!%p3530_p3)
}
  0x64   :  { %138 = dma.hbm_to_vmem [thread:$0]  %s4452_s12, 512, %s3961_s4, [#allocation15], %s3798_s5, %s3798_s5, %s3799_s30  }
  0x65   :  { %s3800_s25 = smov [#allocation17]   ;;  %s3801_s29 = smov [#allocation20]  }
  0x66   :  { %s156_s26 = sshll.u32 %s3800_s25, 4  ;;  %s180_s23 = sshll.u32 %s3801_s29, 4  ;;  %s157_s26 = int_to_ptr.vmem [resolvable:$true] %s156_s26  ;;  %s3998_s23 = int_to_ptr.vmem [resolvable:$true] %s180_s23 }
  0x67   :  { %s3534_s1 = scalar_lea.hbm %s4454_s14, 512 }
  0x68   :  { %p3535_p4 = scmp.ne.s32.totalorder %s4454_s14, %s3534_s1  ;;  %p3538_p5 = scmp.lt.u32.totalorder %s3534_s1, %s4454_s14 }
  0x6a   :  { %p3540_p6 = pnand %p3538_p5, %p3535_p4 }
  0x6c   :  { %3543 = shalt.err (!%p3540_p6)
}
  0x6d   :  { %s3544_s12 = scalar_lea.vmem %s157_s26, 512  ;;  %p3549_p8 = scmp.lt.s32.totalorder %s157_s26, %s157_s26 }
  0x6e   :  { %p3545_p7 = scmp.ne.s32.totalorder %s157_s26, %s3544_s12  ;;  %p3550_p9 = scmp.lt.s32.totalorder %s3544_s12, %s3544_s12 }
  0x70   :  { %p3551_p10 = por %p3550_p9, %p3549_p8 }
  0x72   :  { %p3552_p11 = pnand %p3551_p10, %p3545_p7 }
  0x74   :  { %3555 = shalt.err (!%p3552_p11)
}
  0x75   :  { %162 = dma.hbm_to_vmem [thread:$0]  %s4454_s14, 512, %s157_s26, [#allocation18], %s3798_s5, %s3798_s5, %s3799_s30  }
  0x76   :  { %s3556_s29 = scalar_lea.hbm %s4456_s16, 512 }
  0x77   :  { %p3557_p12 = scmp.ne.s32.totalorder %s4456_s16, %s3556_s29  ;;  %p3560_p13 = scmp.lt.u32.totalorder %s3556_s29, %s4456_s16 }
  0x79   :  { %p3562_p0 = pnand %p3560_p13, %p3557_p12 }
  0x7b   :  { %3565 = shalt.err (!%p3562_p0)
}
  0x7c   :  { %s3566_s2 = scalar_lea.vmem %s3998_s23, 512  ;;  %p3571_p2 = scmp.lt.s32.totalorder %s3998_s23, %s3998_s23 }
  0x7d   :  { %p3567_p1 = scmp.ne.s32.totalorder %s3998_s23, %s3566_s2  ;;  %p3572_p3 = scmp.lt.s32.totalorder %s3566_s2, %s3566_s2 }
  0x7f   :  { %p3573_p4 = por %p3572_p3, %p3571_p2 }
  0x81   :  { %p3574_p5 = pnand %p3573_p4, %p3567_p1 }
  0x83   :  { %3577 = shalt.err (!%p3574_p5)
}
  0x84   :  { %186 = dma.hbm_to_vmem [thread:$0]  %s4456_s16, 512, %s3998_s23, [#allocation21], %s3798_s5, %s3798_s5, %s3799_s30  }
  0x85   :  { %s3802_s7 = smov [#allocation2]   ;;  %s3803_s12 = smov [#allocation7]  }
  0x86   :  { %s42_s28 = sshll.u32 %s3802_s7, 4  ;;  %s66_s4 = sshll.u32 %s3803_s12, 4  ;;  %s43_s28 = int_to_ptr.vmem [resolvable:$true] %s42_s28  ;;  %s4035_s4 = int_to_ptr.vmem [resolvable:$true] %s66_s4 }
  0x87   :  { %s4485_s25 = sld [smem:[#allocation35_spill]] }
  0x8d   :  { %s3578_s29 = scalar_lea.hbm %s4485_s25, 256 }
  0x8e   :  { %p3579_p6 = scmp.ne.s32.totalorder %s4485_s25, %s3578_s29  ;;  %p3582_p7 = scmp.lt.u32.totalorder %s3578_s29, %s4485_s25 }
  0x90   :  { %p3584_p8 = pnand %p3582_p7, %p3579_p6 }
  0x92   :  { %3587 = shalt.err (!%p3584_p8)
}
  0x93   :  { %s3588_s16 = scalar_lea.vmem %s43_s28, 256  ;;  %p3593_p10 = scmp.lt.s32.totalorder %s43_s28, %s43_s28 }
  0x94   :  { %p3589_p9 = scmp.ne.s32.totalorder %s43_s28, %s3588_s16  ;;  %p3594_p11 = scmp.lt.s32.totalorder %s3588_s16, %s3588_s16 }
  0x96   :  { %p3595_p12 = por %p3594_p11, %p3593_p10 }
  0x98   :  { %p3596_p13 = pnand %p3595_p12, %p3589_p9 }
  0x9a   :  { %3599 = shalt.err (!%p3596_p13)
}
  0x9b   :  { %48 = dma.hbm_to_vmem [thread:$0]  %s4485_s25, 256, %s43_s28, [#allocation3], %s3798_s5, %s3798_s5, %s3799_s30  }
  0x9c   :  { %s4486_s7 = sld [smem:[#allocation38_spill]] }
  0xa2   :  { %s3600_s12 = scalar_lea.hbm %s4486_s7, 256 }
  0xa3   :  { %p3601_p0 = scmp.ne.s32.totalorder %s4486_s7, %s3600_s12  ;;  %p3604_p1 = scmp.lt.u32.totalorder %s3600_s12, %s4486_s7 }
  0xa5   :  { %p3606_p2 = pnand %p3604_p1, %p3601_p0 }
  0xa7   :  { %3609 = shalt.err (!%p3606_p2)
}
  0xa8   :  { %s3610_s24 = scalar_lea.vmem %s4035_s4, 256  ;;  %p3615_p4 = scmp.lt.s32.totalorder %s4035_s4, %s4035_s4 }
  0xa9   :  { %p3611_p3 = scmp.ne.s32.totalorder %s4035_s4, %s3610_s24  ;;  %p3616_p5 = scmp.lt.s32.totalorder %s3610_s24, %s3610_s24 }
  0xab   :  { %p3617_p6 = por %p3616_p5, %p3615_p4 }
  0xad   :  { %p3618_p7 = pnand %p3617_p6, %p3611_p3 }
  0xaf   :  { %3621 = shalt.err (!%p3618_p7)
}
  0xb0   :  { %72 = dma.hbm_to_vmem [thread:$0]  %s4486_s7, 256, %s4035_s4, [#allocation6], %s3798_s5, %s3798_s5, %s3799_s30  }
  0xb1   :  { %s3804_s1 = smov [#allocation10]   ;;  %s3805_s16 = smov [#allocation13]  }
  0xb2   :  { %s90_s27 = sshll.u32 %s3804_s1, 4  ;;  %s114_s23 = sshll.u32 %s3805_s16, 4  ;;  %s91_s27 = int_to_ptr.vmem [resolvable:$true] %s90_s27  ;;  %s4072_s23 = int_to_ptr.vmem [resolvable:$true] %s114_s23 }
  0xb3   :  { %s4487_s26 = sld [smem:[#allocation41_spill]] }
  0xb9   :  { %s3622_s12 = scalar_lea.hbm %s4487_s26, 256 }
  0xba   :  { %p3623_p8 = scmp.ne.s32.totalorder %s4487_s26, %s3622_s12  ;;  %p3626_p9 = scmp.lt.u32.totalorder %s3622_s12, %s4487_s26 }
  0xbc   :  { %p3628_p10 = pnand %p3626_p9, %p3623_p8 }
  0xbe   :  { %3631 = shalt.err (!%p3628_p10)
}
  0xbf   :  { %s3632_s4 = scalar_lea.vmem %s91_s27, 256  ;;  %p3637_p12 = scmp.lt.s32.totalorder %s91_s27, %s91_s27 }
  0xc0   :  { %p3633_p11 = scmp.ne.s32.totalorder %s91_s27, %s3632_s4  ;;  %p3638_p13 = scmp.lt.s32.totalorder %s3632_s4, %s3632_s4 }
  0xc2   :  { %p3639_p0 = por %p3638_p13, %p3637_p12 }
  0xc4   :  { %p3640_p1 = pnand %p3639_p0, %p3633_p11 }
  0xc6   :  { %3643 = shalt.err (!%p3640_p1)
}
  0xc7   :  { %96 = dma.hbm_to_vmem [thread:$0]  %s4487_s26, 256, %s91_s27, [#allocation9], %s3798_s5, %s3798_s5, %s3799_s30  }
  0xc8   :  { %s3644_s1 = scalar_lea.hbm %s4448_s8, 256 }
  0xc9   :  { %p3645_p2 = scmp.ne.s32.totalorder %s4448_s8, %s3644_s1  ;;  %p3648_p3 = scmp.lt.u32.totalorder %s3644_s1, %s4448_s8 }
  0xcb   :  { %p3650_p4 = pnand %p3648_p3, %p3645_p2 }
  0xcd   :  { %3653 = shalt.err (!%p3650_p4)
}
  0xce   :  { %s3654_s3 = scalar_lea.vmem %s4072_s23, 256  ;;  %p3659_p6 = scmp.lt.s32.totalorder %s4072_s23, %s4072_s23 }
  0xcf   :  { %p3655_p5 = scmp.ne.s32.totalorder %s4072_s23, %s3654_s3  ;;  %p3660_p7 = scmp.lt.s32.totalorder %s3654_s3, %s3654_s3 }
  0xd1   :  { %p3661_p8 = por %p3660_p7, %p3659_p6 }
  0xd3   :  { %p3662_p9 = pnand %p3661_p8, %p3655_p5 }
  0xd5   :  { %3665 = shalt.err (!%p3662_p9)
}
  0xd6   :  { %120 = dma.hbm_to_vmem [thread:$0]  %s4448_s8, 256, %s4072_s23, [#allocation12], %s3798_s5, %s3798_s5, %s3799_s30  }
  0xd7   :  { %s3806_s6 = smov [#allocation16]   ;;  %s3807_s0 = smov [#allocation19]  }
  0xd8   :  { %s144_s29 = sshll.u32 %s3806_s6, 4  ;;  %s168_s4 = sshll.u32 %s3807_s0, 4  ;;  %s145_s29 = int_to_ptr.vmem [resolvable:$true] %s144_s29  ;;  %s4109_s4 = int_to_ptr.vmem [resolvable:$true] %s168_s4 }
  0xd9   :  { %s3666_s28 = scalar_lea.hbm %s4453_s13, 512 }
  0xda   :  { %p3667_p10 = scmp.ne.s32.totalorder %s4453_s13, %s3666_s28  ;;  %p3670_p11 = scmp.lt.u32.totalorder %s3666_s28, %s4453_s13 }
  0xdc   :  { %p3672_p12 = pnand %p3670_p11, %p3667_p10 }
  0xde   :  { %3675 = shalt.err (!%p3672_p12)
}
  0xdf   :  { %s3676_s8 = scalar_lea.vmem %s145_s29, 512  ;;  %p3681_p0 = scmp.lt.s32.totalorder %s145_s29, %s145_s29 }
  0xe0   :  { %p3677_p13 = scmp.ne.s32.totalorder %s145_s29, %s3676_s8  ;;  %p3682_p1 = scmp.lt.s32.totalorder %s3676_s8, %s3676_s8 }
  0xe2   :  { %p3683_p2 = por %p3682_p1, %p3681_p0 }
  0xe4   :  { %p3684_p3 = pnand %p3683_p2, %p3677_p13 }
  0xe6   :  { %3687 = shalt.err (!%p3684_p3)
}
  0xe7   :  { %150 = dma.hbm_to_vmem [thread:$0]  %s4453_s13, 512, %s145_s29, [#allocation15], %s3798_s5, %s3798_s5, %s3799_s30  }
  0xe8   :  { %s3688_s27 = scalar_lea.hbm %s4455_s15, 512 }
  0xe9   :  { %p3689_p4 = scmp.ne.s32.totalorder %s4455_s15, %s3688_s27  ;;  %p3692_p5 = scmp.lt.u32.totalorder %s3688_s27, %s4455_s15 }
  0xeb   :  { %p3694_p6 = pnand %p3692_p5, %p3689_p4 }
  0xed   :  { %3697 = shalt.err (!%p3694_p6)
}
  0xee   :  { %s3698_s24 = scalar_lea.vmem %s4109_s4, 512  ;;  %p3703_p8 = scmp.lt.s32.totalorder %s4109_s4, %s4109_s4 }
  0xef   :  { %p3699_p7 = scmp.ne.s32.totalorder %s4109_s4, %s3698_s24  ;;  %p3704_p9 = scmp.lt.s32.totalorder %s3698_s24, %s3698_s24 }
  0xf1   :  { %p3705_p10 = por %p3704_p9, %p3703_p8 }
  0xf3   :  { %p3706_p11 = pnand %p3705_p10, %p3699_p7 }
  0xf5   :  { %3709 = shalt.err (!%p3706_p11)
}
  0xf6   :  { %174 = dma.hbm_to_vmem [thread:$0]  %s4455_s15, 512, %s4109_s4, [#allocation18], %s3798_s5, %s3798_s5, %s3799_s30  }
  0xf7   :  { %s3808_s28 = smov [#allocation22]   ;;  %s3809_s1 = smov [#allocation23]  }
  0xf8   :  { %s192_s25 = sshll.u32 %s3808_s28, 4  ;;  %s206_s16 = sshll.u32 %s3809_s1, 4  ;;  %s193_s25 = int_to_ptr.vmem [resolvable:$true] %s192_s25  ;;  %s4146_s16 = int_to_ptr.vmem [resolvable:$true] %s206_s16 }
  0xf9   :  { %s3710_s23 = scalar_lea.hbm %s4457_s17, 512 }
  0xfa   :  { %p3711_p12 = scmp.ne.s32.totalorder %s4457_s17, %s3710_s23  ;;  %p3714_p13 = scmp.lt.u32.totalorder %s3710_s23, %s4457_s17 }
  0xfc   :  { %p3716_p0 = pnand %p3714_p13, %p3711_p12 }
  0xfe   :  { %3719 = shalt.err (!%p3716_p0)
}
  0xff   :  { %s3720_s15 = scalar_lea.vmem %s193_s25, 512  ;;  %p3725_p2 = scmp.lt.s32.totalorder %s193_s25, %s193_s25 }
 0x100   :  { %p3721_p1 = scmp.ne.s32.totalorder %s193_s25, %s3720_s15  ;;  %p3726_p3 = scmp.lt.s32.totalorder %s3720_s15, %s3720_s15 }
 0x102   :  { %p3727_p4 = por %p3726_p3, %p3725_p2 }
 0x104   :  { %p3728_p5 = pnand %p3727_p4, %p3721_p1 }
 0x106   :  { %3731 = shalt.err (!%p3728_p5)
}
 0x107   :  { %198 = dma.hbm_to_vmem [thread:$0]  %s4457_s17, 512, %s193_s25, [#allocation21], %s3798_s5, %s3798_s5, %s3799_s30  }
 0x108   :  { %s3732_s7 = scalar_lea.hbm %s4459_s19, 512 }
 0x109   :  { %p3733_p6 = scmp.ne.s32.totalorder %s4459_s19, %s3732_s7  ;;  %p3736_p7 = scmp.lt.u32.totalorder %s3732_s7, %s4459_s19 }
 0x10b   :  { %p3738_p8 = pnand %p3736_p7, %p3733_p6 }
 0x10d   :  { %3741 = shalt.err (!%p3738_p8)
}
 0x10e   :  { %s3742_s1 = scalar_lea.vmem %s4146_s16, 512  ;;  %p3747_p10 = scmp.lt.s32.totalorder %s4146_s16, %s4146_s16 }
 0x10f   :  { %p3743_p9 = scmp.ne.s32.totalorder %s4146_s16, %s3742_s1  ;;  %p3748_p11 = scmp.lt.s32.totalorder %s3742_s1, %s3742_s1 }
 0x111   :  { %p3749_p12 = por %p3748_p11, %p3747_p10 }
 0x113   :  { %p3750_p13 = pnand %p3749_p12, %p3743_p9 }
 0x115   :  { %3753 = shalt.err (!%p3750_p13)
}
 0x116   :  { %212 = dma.hbm_to_vmem [thread:$0]  %s4459_s19, 512, %s4146_s16, [#allocation24], %s3798_s5, %s3798_s5, %s3799_s30  }
 0x117   :  { %3776 = dma.done.wait [#allocation3], 256  }
 0x118   :  { %3777 = vsyncadd [#allocation3], 4294967040 }
 0x119   :  { %3778 = dma.done.wait [#allocation6], 384  }
 0x11a   :  { %3779 = vsyncadd [#allocation6], 4294966912 }
 0x11b   :  { %3780 = dma.done.wait [#allocation9], 384  }
 0x11c   :  { %3781 = vsyncadd [#allocation9], 4294966912 }
 0x11d   :  { %3782 = dma.done.wait [#allocation12], 512  }
 0x11e   :  { %3783 = vsyncadd [#allocation12], 4294966784 }
 0x11f   :  { %3784 = dma.done.wait [#allocation15], 1024  }
 0x120   :  { %3785 = vsyncadd [#allocation15], 4294966272 }
 0x121   :  { %3786 = dma.done.wait [#allocation18], 1024  }
 0x122   :  { %3787 = vsyncadd [#allocation18], 4294966272 }
 0x123   :  { %3788 = dma.done.wait [#allocation21], 1024  }
 0x124   :  { %3789 = vsyncadd [#allocation21], 4294966272 }
 0x125   :  { %3790 = dma.done.wait [#allocation24], 512  }
 0x126   :  { %3791 = vsyncadd [#allocation24], 4294966784  ;;  %vm281_vm0 = vcmask 130048   ;;  %v275_v0 = vld [vmem:[#allocation10] sm:$0xff]  ;;  %v276_v1 = vld [vmem:[#allocation10 + $0x8] sm:$0xff]  ;;  %s4488_s30 = sld [smem:[#allocation36_spill]] }
 0x127   :  { %v268_v2 = vld [vmem:[#allocation2] sm:$0xff]  ;;  %v3147_v3 = vpack.c.bf16 %v276_v1, %v275_v0  ;;  %v278_v5 = vld [vmem:[#allocation11 + $0x8] sm:$0xff]  ;;  %v279_v7 = vld [vmem:[#allocation13] sm:$0xff]  ;;  %v3810_v12 = vmov 0.0|0.0   ;;  %vm3811_vm1 = vmmov 0   ;;  %v3812_v15 = vmov 0.0  }
 0x128   :  { %2822 = vmatprep.mubr.msk.f32.mxu0 %vm281_vm0, %v268_v2  ;;  %v277_v4 = vld [vmem:[#allocation11] sm:$0xff]  ;;  %v280_v8 = vld [vmem:[#allocation13 + $0x8] sm:$0xff]  ;;  %v269_v10 = vld [vmem:[#allocation2 + $0x8] sm:$0xff]  ;;  %s3813_s3 = smov 32   ;;  %vm536_vm2 = vcmask 392192   ;;  %s3814_s27 = smov 64  }
 0x129   :  { %v3151_v6 = vpack.c.bf16 %v278_v5, %v277_v4  ;;  %3148 = vmatprep.subr.bf16.mxu0 %v3147_v3  ;;  %v3156_v11 = vpack.c.bf16 %v280_v8, %v279_v7  ;;  %v274_v16 = vld [vmem:[#allocation5] sm:$0xff]  ;;  %v4206_v28 = vld [vmem:[#allocation7] sm:$0xff]  ;;  %s3815_s15 = smov 96   ;;  %v4213_v33 = vld [vmem:[#allocation7 + $0x8] sm:$0xff]  ;;  %s4489_s6 = sld [smem:[#allocation39_spill]]  ;;  %vm649_vm3 = vcmask 457728  }
 0x12a   :  { %3150 = vmatpush3.bf16.msra.mxu0 %v3147_v3  ;;  %v4233_v50 = vld [vmem:[#allocation8] sm:$0xff]  ;;  %vm770_vm4 = vcmask 326656   ;;  %v846_v60 = vld [vmem:[%s4449_s9] sm:$0xff]  ;;  %v848_v63 = vld [vmem:[%s4449_s9 + $0x10] sm:$0xff]  ;;  %vm858_vm5 = vcmask 261120   ;;  %vm2554_vm6 = vcmask 58368  }
 0x12b   :  { %3152 = vmatprep.subr.bf16.mxu1 %v3151_v6  ;;  %3155 = vmatprep.subr.bf16.mxu0 %v3810_v12  ;;  %v847_v61 = vld [vmem:[%s4449_s9 + $0x8] sm:$0xff]  ;;  %v849_v0 = vld [vmem:[%s4449_s9 + $0x18] sm:$0xff] }
 0x12c   :  { %v270_v9 = vld [vmem:[%s4488_s30] sm:$0xff]  ;;  %3154 = vmatpush3.bf16.msra.mxu1 %v3151_v6  ;;  %v271_v13 = vld [vmem:[%s4488_s30 + $0x8] sm:$0xff]  ;;  %v272_v14 = vld [vmem:[%s4488_s30 + $0x10] sm:$0xff]  ;;  %v3188_v1 = vpack.c.bf16 %v847_v61, %v846_v60  ;;  %v3192_v5 = vpack.c.bf16 %v849_v0, %v848_v63 }
 0x12d   :  { %2829 = vmatprep.mubr.msk.f32.mxu1 %vm281_vm0, %v270_v9  ;;  %2823 = vmatmul.mubr.msk.f32.vlgmr.msra.gmra.mrb[0].mxu0 %vm281_vm0, %v269_v10  ;;  %v273_v17 = vld [vmem:[%s4488_s30 + $0x18] sm:$0xff]  ;;  %v854_v9 = vld [vmem:[%s4451_s11] sm:$0xff]  ;;  %v855_v10 = vld [vmem:[%s4451_s11 + $0x8] sm:$0xff] }
 0x12e   :  { %3157 = vmatpush3.bf16.msra.mxu0 %v3156_v11  ;;  %2839 = vmatprep.mubr.msk.f32.mxu0 %vm3811_vm1, %v3812_v15 }
 0x12f   :  { %2830 = vmatmul.mubr.msk.f32.vlgmr.msra.gmra.mrb[0].mxu1 %vm281_vm0, %v271_v13  ;;  %v4225_v36 = vld [vmem:[%s4489_s6] sm:$0xff]  ;;  %v4252_v2 = vld [vmem:[%s4489_s6 + $0x8] sm:$0xff]  ;;  %v4257_v4 = vld [vmem:[%s4489_s6 + $0x10] sm:$0xff]  ;;  %v3205_v13 = vpack.c.bf16 %v855_v10, %v854_v9 }
 0x130   :  { %2832 = vmatprep.mubr.msk.f32.mxu1 %vm281_vm0, %v272_v14  ;;  %v4266_v7 = vld [vmem:[%s4489_s6 + $0x18] sm:$0xff]  ;;  %v856_v14 = vld [vmem:[%s4451_s11 + $0x10] sm:$0xff] }
 0x131   :  { %2840 = vmatmul.mubr.msk.f32.vlgmr.msra.gmra.mrb[2].mxu0 %vm281_vm0, %v274_v16  ;;  %v857_v16 = vld [vmem:[%s4451_s11 + $0x18] sm:$0xff] }
 0x132   :  { %2871 = vmatprep.mubr.msk.f32.mxu0 %vm649_vm3, %v4225_v36 }
 0x133   :  { %2833 = vmatmul.mubr.msk.f32.gmra.mrb[2].mxu1 %vm281_vm0, %v273_v17  ;;  %v3208_v17 = vpack.c.bf16 %v857_v16, %v856_v14 }
 0x134   :  { %2854 = vmatprep.mubr.msk.f32.mxu1 %vm536_vm2, %v4206_v28 }
 0x200   :  { %v2824_v18 = vpop.f32.mrb[0].mxu0 }
 0x201   :  { %v354_v19 = vpop.f32.mrb[1].mxu0 }
 0x202   :  { %v3377_v20 = vpack.i.bf16 %v2824_v18, %v354_v19  ;;  %v3158_v21 = vpack.c.bf16 %v2824_v18, %v354_v19  ;;  %v2831_v22 = vpop.f32.mrb[0].mxu1  ;;  %v850_v18 = vld [vmem:[%s4450_s10] sm:$0xff]  ;;  %v851_v19 = vld [vmem:[%s4450_s10 + $0x8] sm:$0xff] }
 0x203   :  { %v441_v23 = vpop.f32.mrb[1].mxu1 }
 0x204   :  { %v529_v24 = vpop.f32.mrb[2].mxu0  ;;  %3159 = vmatprep.subr.bf16.mxu1 %v3158_v21  ;;  %v3382_v25 = vpack.i.bf16 %v2831_v22, %v441_v23  ;;  %v3162_v26 = vpack.c.bf16 %v2831_v22, %v441_v23  ;;  %v853_v22 = vld [vmem:[%s4450_s10 + $0x18] sm:$0xff] }
 0x205   :  { %3161 = vmatpush3.bf16.msra.mxu1 %v3158_v21  ;;  %534 = vrot.lane.b32.xlu0 %v529_v24, %s3813_s3  ;;  %v2841_v27 = vpop.f32.mrb[3].mxu0  ;;  %v852_v21 = vld [vmem:[%s4450_s10 + $0x10] sm:$0xff] }
 0x206   :  { %v2834_v29 = vpop.f32.mrb[2].mxu1  ;;  %3163 = vmatprep.subr.bf16.mxu1 %v3162_v26  ;;  %v3200_v23 = vpack.c.bf16 %v853_v22, %v852_v21  ;;  %v1399_v21 = vld [vmem:[#allocation14] sm:$0xff]  ;;  %v1400_v22 = vld [vmem:[#allocation14 + $0x8] sm:$0xff] }
 0x207   :  { %v451_v30 = vpop.f32.mrb[3].mxu1 }
 0x208   :  { %v3387_v31 = vpack.i.bf16 %v2834_v29, %v451_v30  ;;  %v3166_v32 = vpack.c.bf16 %v2834_v29, %v451_v30 }
 0x209   :  { %3368 = vrot.lane.b32.xlu0 %v3382_v25, %s3814_s27  ;;  %3165 = vmatpush3.bf16.msra.mxu1 %v3162_v26 }
 0x20a   :  { %3167 = vmatprep.subr.bf16.mxu1 %v3166_v32  ;;  %3373 = vrot.lane.b32.xlu1 %v3387_v31, %s3814_s27 }
 0x20d   :  { %3378 = vrot.lane.b32.xlu0 %v3377_v20, %s3815_s15  ;;  %3169 = vmatpush3.bf16.msra.mxu1 %v3166_v32  ;;  %v3196_v20 = vpack.c.bf16 %v851_v19, %v850_v18 }
 0x20e   :  { %3182 = vmatprep.subr.bf16.mxu1 %v3810_v12 }
 0x210   :  { %2855 = vmatmul.mubr.msk.f32.vlgmr.msra.gmra.mrb[4].mxu1 %vm536_vm2, %v4213_v33 }
 0x211   :  { %3388 = vrot.lane.b32.xlu0 %v3387_v31, %s3815_s15  ;;  %2887 = vmatprep.mubr.msk.f32.mxu1 %vm3811_vm1, %v3812_v15 }
 0x277   :  { %v535_v34 = vpop.permute.xlu0 %534 }
 0x278   :  { %763 = vrot.lane.b32.xlu1 %v535_v34, %s3814_s27 }
 0x27b   :  { %v3369_v35 = vpop.permute.xlu0 %3368 }
 0x27c   :  { %v3371_v37 = vunpack.i.h.bf16 %v3369_v35  ;;  %v3370_v38 = vunpack.i.l.bf16 %v3369_v35  ;;  %3383 = vrot.lane.b32.xlu1 %v3382_v25, %s3815_s15  ;;  %v3374_v39 = vpop.permute.xlu1 %3373 }
 0x27d   :  { %v3376_v40 = vunpack.i.h.bf16 %v3374_v39  ;;  %v3375_v41 = vunpack.i.l.bf16 %v3374_v39 }
 0x27e   :  { %v3183_v42 = vpack.c.bf16 %v3371_v37, %v3370_v38 }
 0x27f   :  { %v3379_v43 = vpop.permute.xlu0 %3378  ;;  %v3186_v46 = vpack.c.bf16 %v3376_v40, %v3375_v41 }
 0x280   :  { %v3381_v44 = vunpack.i.h.bf16 %v3379_v43  ;;  %v3380_v45 = vunpack.i.l.bf16 %v3379_v43  ;;  %640 = vrot.lane.b32.xlu1 %v535_v34, %s3815_s15  ;;  %3184 = vmatpush3.bf16.msra.mxu1 %v3183_v42 }
 0x281   :  { %3185 = vmatprep.subr.bf16.mxu1 %v3810_v12 }
 0x282   :  { %v3170_v47 = vpack.c.bf16 %v3381_v44, %v3380_v45 }
 0x283   :  { %v3389_v52 = vpop.permute.xlu0 %3388 }
 0x284   :  { %3171 = vmatprep.subr.bf16.mxu0 %v3170_v47  ;;  %3187 = vmatpush3.bf16.msra.mxu1 %v3186_v46  ;;  %v3391_v54 = vunpack.i.h.bf16 %v3389_v52  ;;  %v3390_v55 = vunpack.i.l.bf16 %v3389_v52 }
 0x285   :  { %3173 = vmatpush3.bf16.msra.mxu0 %v3170_v47  ;;  %2885 = vmatprep.subr.mxu1 %v3812_v15 }
 0x286   :  { %v3178_v59 = vpack.c.bf16 %v3391_v54, %v3390_v55 }
 0x2e3   :  { %v2856_v48 = vpop.f32.mrb[4].mxu1 }
 0x2e4   :  { %v609_v49 = vpop.f32.mrb[5].mxu1  ;;  %v619_v6 = vmax.f32 %v2856_v48, 0.0 }
 0x2e5   :  { %v618_v3 = vmax.f32 %v609_v49, 0.0 }
 0x2e6   :  { %v621_v11 = vmul.f32 0.5, %v619_v6 }
 0x2e7   :  { %v620_v8 = vmul.f32 0.5, %v618_v3 }
 0x2ea   :  { %v764_v51 = vpop.permute.xlu1 %763 }
 0x2eb   :  { %2886 = vmatpush3.msra.mxu1 %v764_v51 }
 0x2ec   :  { %2888 = vmatmul.mubr.msk.f32.vlgmr.msra.gmra.mrb[6].mxu1 %vm770_vm4, %v4233_v50  ;;  %3197 = vmatprep.subr.bf16.mxu1 %v3196_v20 }
 0x2ed   :  { %3199 = vmatpush3.bf16.msra.mxu1 %v3196_v20 }
 0x2ee   :  { %v3384_v53 = vpop.permute.xlu1 %3383  ;;  %3201 = vmatprep.subr.bf16.mxu1 %v3200_v23 }
 0x2ef   :  { %v3386_v56 = vunpack.i.h.bf16 %v3384_v53  ;;  %v3385_v57 = vunpack.i.l.bf16 %v3384_v53 }
 0x2f1   :  { %v3174_v58 = vpack.c.bf16 %v3386_v56, %v3385_v57  ;;  %3203 = vmatpush3.bf16.msra.mxu1 %v3200_v23 }
 0x2f2   :  { %v641_v62 = vpop.permute.xlu1 %640 }
 0x2f3   :  { %3175 = vmatprep.subr.bf16.mxu0 %v3174_v58 }
 0x2f4   :  { %3177 = vmatpush3.bf16.msra.mxu0 %v3174_v58 }
 0x2f5   :  { %3179 = vmatprep.subr.bf16.mxu0 %v3178_v59 }
 0x2f8   :  { %3181 = vmatpush3.bf16.msra.mxu0 %v3178_v59 }
 0x2f9   :  { %2869 = vmatprep.subr.mxu0 %v641_v62 }
 0x2fc   :  { %2870 = vmatpush3.msra.mxu0 %v641_v62 }
 0x2fd   :  { %2872 = vmatmul.mubr.msk.f32.vlgmr.msra.gmra.mrb[4].mxu0 %vm649_vm3, %v4252_v2  ;;  %3189 = vmatprep.subr.bf16.mxu0 %v3188_v1 }
 0x2fe   :  { %2874 = vmatprep.mubr.msk.f32.mxu0 %vm649_vm3, %v4257_v4  ;;  %3191 = vmatpush3.bf16.msra.mxu0 %v3188_v1 }
 0x2ff   :  { %3193 = vmatprep.subr.bf16.mxu0 %v3192_v5 }
 0x301   :  { %2875 = vmatmul.mubr.msk.f32.gmra.mrb[6].mxu0 %vm649_vm3, %v4266_v7 }
 0x302   :  { %3195 = vmatpush3.bf16.msra.mxu0 %v3192_v5  ;;  %2898 = vmatprep.mubr.msk.f32.mxu0 %vm858_vm5, %v620_v8 }
 0x303   :  { %3204 = vmatprep.subr.bf16.mxu0 %v3810_v12 }
 0x305   :  { %2899 = vmatmul.mubr.msk.f32.vlgmr.msra.gmra.mrb[8].mxu0 %vm858_vm5, %v621_v11 }
 0x306   :  { %3206 = vmatpush3.bf16.msra.mxu0 %v3205_v13  ;;  %2923 = vmatprep.mubr.msk.f32.mxu0 %vm3811_vm1, %v3812_v15 }
 0x307   :  { %3207 = vmatprep.subr.bf16.mxu0 %v3810_v12 }
 0x30a   :  { %3209 = vmatpush3.bf16.msra.mxu0 %v3208_v17 }
 0x3bf   :  { %v840_v24 = vpop.f32.mrb[6].mxu1 }
 0x3c0   :  { %v844_v25 = vmax.f32 %v840_v24, 0.0  ;;  %v2889_v26 = vpop.f32.mrb[7].mxu1 }
 0x3c1   :  { %v1401_v26 = vld [vmem:[#allocation14 + $0x10] sm:$0xff] }
 0x3c2   :  { %v845_v27 = vmul.f32 0.5, %v844_v25 }
 0x3c4   :  { %2924 = vmatmul.mubr.msk.f32.vlgmr.msra.gmra.mrb[10].mxu0 %vm858_vm5, %v845_v27  ;;  %v1402_v27 = vld [vmem:[#allocation14 + $0x18] sm:$0xff] }
 0x3c5   :  { %2955 = vmatprep.mubr.msk.f32.mxu0 %vm649_vm3, %v4225_v36 }
 0x3d0   :  { %v2873_v29 = vpop.f32.mrb[4].mxu0 }
 0x3d1   :  { %v748_v30 = vmax.f32 %v2873_v29, 0.0  ;;  %v728_v31 = vpop.f32.mrb[5].mxu0  ;;  %v3240_v29 = vpack.c.bf16 %v1400_v22, %v1399_v21 }
 0x3d2   :  { %v747_v32 = vmax.f32 %v728_v31, 0.0  ;;  %v3244_v31 = vpack.c.bf16 %v1402_v27, %v1401_v26 }
 0x3d3   :  { %v752_v34 = vmul.f32 0.33333334, %v748_v30 }
 0x3d4   :  { %v751_v35 = vmul.f32 0.33333334, %v747_v32  ;;  %v2876_v37 = vpop.f32.mrb[6].mxu0 }
 0x3d5   :  { %v750_v38 = vmax.f32 %v2876_v37, 0.0  ;;  %v738_v39 = vpop.f32.mrb[7].mxu0  ;;  %v1408_v37 = vld [vmem:[#allocation17 + $0x8] sm:$0xff] }
 0x3d6   :  { %v749_v40 = vmax.f32 %v738_v39, 0.0  ;;  %2909 = vmatprep.mubr.msk.f32.mxu1 %vm858_vm5, %v751_v35  ;;  %v1407_v35 = vld [vmem:[#allocation17] sm:$0xff] }
 0x3d7   :  { %v754_v41 = vmul.f32 0.33333334, %v750_v38  ;;  %2910 = vmatmul.mubr.msk.f32.vlgmr.msra.gmra.mrb[8].mxu1 %vm858_vm5, %v752_v34  ;;  %v3257_v39 = vpack.c.bf16 %v1408_v37, %v1407_v35 }
 0x3d8   :  { %v753_v42 = vmul.f32 0.33333334, %v749_v40  ;;  %v2900_v43 = vpop.f32.mrb[8].mxu0  ;;  %v1409_v40 = vld [vmem:[#allocation17 + $0x10] sm:$0xff] }
 0x3d9   :  { %v931_v44 = vpop.f32.mrb[9].mxu0 }
 0x3da   :  { %2912 = vmatprep.mubr.msk.f32.mxu1 %vm858_vm5, %v753_v42  ;;  %v3402_v45 = vpack.i.bf16 %v2900_v43, %v931_v44  ;;  %v3210_v46 = vpack.c.bf16 %v2900_v43, %v931_v44  ;;  %v1403_v43 = vld [vmem:[#allocation16] sm:$0xff]  ;;  %v1404_v44 = vld [vmem:[#allocation16 + $0x8] sm:$0xff] }
 0x3db   :  { %2913 = vmatmul.mubr.msk.f32.gmra.mrb[10].mxu1 %vm858_vm5, %v754_v41  ;;  %v1410_v41 = vld [vmem:[#allocation17 + $0x18] sm:$0xff] }
 0x3dc   :  { %3211 = vmatprep.subr.bf16.mxu1 %v3210_v46  ;;  %2938 = vmatprep.mubr.msk.f32.mxu1 %vm536_vm2, %v4206_v28  ;;  %v3260_v42 = vpack.c.bf16 %v1410_v41, %v1409_v40  ;;  %v1952_v40 = vld [vmem:[#allocation19 + $0x8] sm:$0xff]  ;;  %v1953_v41 = vld [vmem:[#allocation19 + $0x10] sm:$0xff] }
 0x3dd   :  { %3213 = vmatpush3.bf16.msra.mxu1 %v3210_v46  ;;  %v1405_v46 = vld [vmem:[#allocation16 + $0x10] sm:$0xff] }
 0x497   :  { %v1106_v47 = vpop.f32.mrb[10].mxu0 }
 0x498   :  { %1111 = vrot.lane.b32.xlu0 %v1106_v47, %s3813_s3  ;;  %v2925_v48 = vpop.f32.mrb[11].mxu0  ;;  %v1406_v47 = vld [vmem:[#allocation16 + $0x18] sm:$0xff] }
 0x499   :  { %v3252_v48 = vpack.c.bf16 %v1406_v47, %v1405_v46 }
 0x4aa   :  { %v2911_v49 = vpop.f32.mrb[8].mxu1 }
 0x4ab   :  { %v1018_v51 = vpop.f32.mrb[9].mxu1 }
 0x4ac   :  { %v3407_v52 = vpack.i.bf16 %v2911_v49, %v1018_v51  ;;  %v3214_v53 = vpack.c.bf16 %v2911_v49, %v1018_v51 }
 0x4ae   :  { %v2914_v54 = vpop.f32.mrb[10].mxu1  ;;  %3215 = vmatprep.subr.bf16.mxu1 %v3214_v53  ;;  %3393 = vrot.lane.b32.xlu1 %v3407_v52, %s3814_s27 }
 0x4af   :  { %v1028_v55 = vpop.f32.mrb[11].mxu1  ;;  %3217 = vmatpush3.bf16.msra.mxu1 %v3214_v53 }
 0x4b0   :  { %v3412_v56 = vpack.i.bf16 %v2914_v54, %v1028_v55  ;;  %v3218_v57 = vpack.c.bf16 %v2914_v54, %v1028_v55 }
 0x4b2   :  { %3398 = vrot.lane.b32.xlu0 %v3412_v56, %s3814_s27  ;;  %3219 = vmatprep.subr.bf16.mxu1 %v3218_v57 }
 0x4b3   :  { %3221 = vmatpush3.bf16.msra.mxu1 %v3218_v57 }
 0x4b4   :  { %3234 = vmatprep.subr.bf16.mxu1 %v3810_v12 }
 0x4b6   :  { %3403 = vrot.lane.b32.xlu0 %v3402_v45, %s3815_s15  ;;  %2939 = vmatmul.mubr.msk.f32.vlgmr.msra.gmra.mrb[12].mxu1 %vm536_vm2, %v4213_v33  ;;  %v3248_v45 = vpack.c.bf16 %v1404_v44, %v1403_v43 }
 0x4b7   :  { %2971 = vmatprep.mubr.msk.f32.mxu1 %vm3811_vm1, %v3812_v15 }
 0x4ba   :  { %3413 = vrot.lane.b32.xlu0 %v3412_v56, %s3815_s15 }
 0x50a   :  { %v1112_v58 = vpop.permute.xlu0 %1111 }
 0x50b   :  { %1320 = vrot.lane.b32.xlu1 %v1112_v58, %s3814_s27 }
 0x50f   :  { %3408 = vrot.lane.b32.xlu1 %v3407_v52, %s3815_s15 }
 0x513   :  { %1210 = vrot.lane.b32.xlu1 %v1112_v58, %s3815_s15 }
 0x520   :  { %v3394_v59 = vpop.permute.xlu1 %3393 }
 0x521   :  { %v3396_v60 = vunpack.i.h.bf16 %v3394_v59  ;;  %v3395_v61 = vunpack.i.l.bf16 %v3394_v59 }
 0x523   :  { %v3235_v62 = vpack.c.bf16 %v3396_v60, %v3395_v61 }
 0x524   :  { %v3399_v63 = vpop.permute.xlu0 %3398 }
 0x525   :  { %v3401_v0 = vunpack.i.h.bf16 %v3399_v63  ;;  %v3400_v1 = vunpack.i.l.bf16 %v3399_v63  ;;  %3236 = vmatpush3.bf16.msra.mxu1 %v3235_v62 }
 0x526   :  { %3237 = vmatprep.subr.bf16.mxu1 %v3810_v12 }
 0x527   :  { %v3238_v3 = vpack.c.bf16 %v3401_v0, %v3400_v1 }
 0x528   :  { %v3404_v5 = vpop.permute.xlu0 %3403 }
 0x529   :  { %v3406_v6 = vunpack.i.h.bf16 %v3404_v5  ;;  %v3405_v8 = vunpack.i.l.bf16 %v3404_v5  ;;  %3239 = vmatpush3.bf16.msra.mxu1 %v3238_v3 }
 0x52a   :  { %2969 = vmatprep.subr.mxu1 %v3812_v15 }
 0x52b   :  { %v3222_v9 = vpack.c.bf16 %v3406_v6, %v3405_v8 }
 0x52c   :  { %v3414_v11 = vpop.permute.xlu0 %3413 }
 0x52d   :  { %3223 = vmatprep.subr.bf16.mxu0 %v3222_v9  ;;  %v3416_v14 = vunpack.i.h.bf16 %v3414_v11  ;;  %v3415_v16 = vunpack.i.l.bf16 %v3414_v11 }
 0x52e   :  { %3225 = vmatpush3.bf16.msra.mxu0 %v3222_v9 }
 0x52f   :  { %v3230_v20 = vpack.c.bf16 %v3416_v14, %v3415_v16 }
 0x57d   :  { %v1321_v10 = vpop.permute.xlu1 %1320 }
 0x57e   :  { %2970 = vmatpush3.msra.mxu1 %v1321_v10 }
 0x57f   :  { %2972 = vmatmul.mubr.msk.f32.vlgmr.msra.gmra.mrb[14].mxu1 %vm770_vm4, %v4233_v50  ;;  %3249 = vmatprep.subr.bf16.mxu1 %v3248_v45 }
 0x580   :  { %3251 = vmatpush3.bf16.msra.mxu1 %v3248_v45 }
 0x581   :  { %v3409_v13 = vpop.permute.xlu1 %3408  ;;  %3253 = vmatprep.subr.bf16.mxu1 %v3252_v48 }
 0x582   :  { %v3411_v17 = vunpack.i.h.bf16 %v3409_v13  ;;  %v3410_v18 = vunpack.i.l.bf16 %v3409_v13 }
 0x584   :  { %v3226_v19 = vpack.c.bf16 %v3411_v17, %v3410_v18  ;;  %3255 = vmatpush3.bf16.msra.mxu1 %v3252_v48 }
 0x585   :  { %v1211_v25 = vpop.permute.xlu1 %1210 }
 0x586   :  { %3227 = vmatprep.subr.bf16.mxu0 %v3226_v19 }
 0x587   :  { %3229 = vmatpush3.bf16.msra.mxu0 %v3226_v19 }
 0x588   :  { %3231 = vmatprep.subr.bf16.mxu0 %v3230_v20 }
 0x589   :  { %v2940_v23 = vpop.f32.mrb[12].mxu1 }
 0x58a   :  { %v1179_v24 = vpop.f32.mrb[13].mxu1  ;;  %v1189_v32 = vmax.f32 %v2940_v23, 0.0 }
 0x58b   :  { %3233 = vmatpush3.bf16.msra.mxu0 %v3230_v20  ;;  %v1188_v30 = vmax.f32 %v1179_v24, 0.0 }
 0x58c   :  { %2953 = vmatprep.subr.mxu0 %v1211_v25  ;;  %v1191_v38 = vmul.f32 0.5, %v1189_v32 }
 0x58d   :  { %v1190_v34 = vmul.f32 0.5, %v1188_v30 }
 0x58f   :  { %2954 = vmatpush3.msra.mxu0 %v1211_v25 }
 0x590   :  { %2956 = vmatmul.mubr.msk.f32.vlgmr.msra.gmra.mrb[12].mxu0 %vm649_vm3, %v4252_v2  ;;  %3241 = vmatprep.subr.bf16.mxu0 %v3240_v29 }
 0x591   :  { %2958 = vmatprep.mubr.msk.f32.mxu0 %vm649_vm3, %v4257_v4  ;;  %3243 = vmatpush3.bf16.msra.mxu0 %v3240_v29 }
 0x592   :  { %3245 = vmatprep.subr.bf16.mxu0 %v3244_v31 }
 0x594   :  { %2959 = vmatmul.mubr.msk.f32.gmra.mrb[14].mxu0 %vm649_vm3, %v4266_v7 }
 0x595   :  { %3247 = vmatpush3.bf16.msra.mxu0 %v3244_v31  ;;  %2982 = vmatprep.mubr.msk.f32.mxu0 %vm858_vm5, %v1190_v34 }
 0x596   :  { %3256 = vmatprep.subr.bf16.mxu0 %v3810_v12 }
 0x598   :  { %2983 = vmatmul.mubr.msk.f32.vlgmr.msra.gmra.mrb[16].mxu0 %vm858_vm5, %v1191_v38 }
 0x599   :  { %3258 = vmatpush3.bf16.msra.mxu0 %v3257_v39  ;;  %3007 = vmatprep.mubr.msk.f32.mxu0 %vm3811_vm1, %v3812_v15  ;;  %v1951_v39 = vld [vmem:[#allocation19] sm:$0xff] }
 0x59a   :  { %3259 = vmatprep.subr.bf16.mxu0 %v3810_v12  ;;  %v3292_v43 = vpack.c.bf16 %v1952_v40, %v1951_v39 }
 0x59d   :  { %3261 = vmatpush3.bf16.msra.mxu0 %v3260_v42  ;;  %v1954_v42 = vld [vmem:[#allocation19 + $0x18] sm:$0xff] }
 0x59e   :  { %v3296_v45 = vpack.c.bf16 %v1954_v42, %v1953_v41 }
 0x652   :  { %v1393_v49 = vpop.f32.mrb[14].mxu1 }
 0x653   :  { %v1397_v51 = vmax.f32 %v1393_v49, 0.0  ;;  %v2973_v52 = vpop.f32.mrb[15].mxu1 }
 0x654   :  { %v2037_v52 = vld [vmem:[#allocation20 + $0x8] sm:$0xff] }
 0x655   :  { %v1398_v53 = vmul.f32 0.5, %v1397_v51  ;;  %v2036_v51 = vld [vmem:[#allocation20] sm:$0xff] }
 0x657   :  { %3008 = vmatmul.mubr.msk.f32.vlgmr.msra.gmra.mrb[18].mxu0 %vm858_vm5, %v1398_v53  ;;  %v3300_v53 = vpack.c.bf16 %v2037_v52, %v2036_v51  ;;  %v2385_v52 = vld [vmem:[#allocation23] sm:$0xff] }
 0x658   :  { %3039 = vmatprep.mubr.msk.f32.mxu0 %vm649_vm3, %v4225_v36 }
 0x663   :  { %v2957_v54 = vpop.f32.mrb[12].mxu0 }
 0x664   :  { %v1305_v55 = vmax.f32 %v2957_v54, 0.0  ;;  %v1285_v56 = vpop.f32.mrb[13].mxu0 }
 0x665   :  { %v1304_v57 = vmax.f32 %v1285_v56, 0.0 }
 0x666   :  { %v1309_v58 = vmul.f32 0.33333334, %v1305_v55 }
 0x667   :  { %v1308_v59 = vmul.f32 0.33333334, %v1304_v57  ;;  %v2960_v60 = vpop.f32.mrb[14].mxu0 }
 0x668   :  { %v1307_v61 = vmax.f32 %v2960_v60, 0.0  ;;  %v1295_v62 = vpop.f32.mrb[15].mxu0 }
 0x669   :  { %v1306_v63 = vmax.f32 %v1295_v62, 0.0  ;;  %2993 = vmatprep.mubr.msk.f32.mxu1 %vm858_vm5, %v1308_v59  ;;  %v2039_v62 = vld [vmem:[#allocation20 + $0x18] sm:$0xff] }
 0x66a   :  { %v1311_v0 = vmul.f32 0.33333334, %v1307_v61  ;;  %2994 = vmatmul.mubr.msk.f32.vlgmr.msra.gmra.mrb[16].mxu1 %vm858_vm5, %v1309_v58  ;;  %v2038_v61 = vld [vmem:[#allocation20 + $0x10] sm:$0xff] }
 0x66b   :  { %v1310_v1 = vmul.f32 0.33333334, %v1306_v63  ;;  %v2984_v3 = vpop.f32.mrb[16].mxu0  ;;  %v3304_v63 = vpack.c.bf16 %v2039_v62, %v2038_v61  ;;  %v2471_v61 = vld [vmem:[%s4461_s21 + $0x8] sm:$0xff] }
 0x66c   :  { %v1483_v5 = vpop.f32.mrb[17].mxu0 }
 0x66d   :  { %2996 = vmatprep.mubr.msk.f32.mxu1 %vm858_vm5, %v1310_v1  ;;  %v3417_v6 = vpack.i.bf16 %v2984_v3, %v1483_v5  ;;  %v3262_v8 = vpack.c.bf16 %v2984_v3, %v1483_v5  ;;  %v2138_v1 = vld [vmem:[#allocation22 + $0x8] sm:$0xff]  ;;  %v2139_v3 = vld [vmem:[#allocation22 + $0x10] sm:$0xff]  ;;  %v2140_v5 = vld [vmem:[#allocation22 + $0x18] sm:$0xff] }
 0x66e   :  { %2997 = vmatmul.mubr.msk.f32.gmra.mrb[18].mxu1 %vm858_vm5, %v1311_v0  ;;  %v2137_v0 = vld [vmem:[#allocation22] sm:$0xff] }
 0x66f   :  { %3418 = vrot.lane.b32.xlu1 %v3417_v6, %s3815_s15  ;;  %3263 = vmatprep.subr.bf16.mxu1 %v3262_v8  ;;  %v3312_v6 = vpack.c.bf16 %v2140_v5, %v2139_v3  ;;  %v2643_v3 = vld [vmem:[%s4460_s20] ss:$0 sm:$0xff]  ;;  %s3816_s20 = smov [#allocation25]  }
 0x670   :  { %3265 = vmatpush3.bf16.msra.mxu1 %v3262_v8  ;;  %3022 = vmatprep.mubr.msk.f32.mxu1 %vm536_vm2, %v4206_v28 }
 0x6e1   :  { %v3419_v9 = vpop.permute.xlu1 %3418 }
 0x6e2   :  { %v3421_v10 = vunpack.i.h.bf16 %v3419_v9  ;;  %v3420_v11 = vunpack.i.l.bf16 %v3419_v9 }
 0x6e4   :  { %v3274_v13 = vpack.c.bf16 %v3421_v10, %v3420_v11 }
 0x6e6   :  { %3275 = vmatprep.subr.bf16.mxu0 %v3274_v13 }
 0x6e7   :  { %3277 = vmatpush3.bf16.msra.mxu0 %v3274_v13 }
 0x72a   :  { %v1658_v14 = vpop.f32.mrb[18].mxu0 }
 0x72b   :  { %1663 = vrot.lane.b32.xlu0 %v1658_v14, %s3813_s3  ;;  %v3009_v16 = vpop.f32.mrb[19].mxu0 }
 0x73d   :  { %v2995_v17 = vpop.f32.mrb[16].mxu1 }
 0x73e   :  { %v1570_v18 = vpop.f32.mrb[17].mxu1 }
 0x73f   :  { %v3432_v19 = vpack.i.bf16 %v2995_v17, %v1570_v18  ;;  %v3266_v20 = vpack.c.bf16 %v2995_v17, %v1570_v18 }
 0x741   :  { %v2998_v21 = vpop.f32.mrb[18].mxu1  ;;  %3267 = vmatprep.subr.bf16.mxu1 %v3266_v20  ;;  %3423 = vrot.lane.b32.xlu0 %v3432_v19, %s3815_s15 }
 0x742   :  { %v1580_v22 = vpop.f32.mrb[19].mxu1  ;;  %3269 = vmatpush3.bf16.msra.mxu1 %v3266_v20 }
 0x743   :  { %v3437_v28 = vpack.i.bf16 %v2998_v21, %v1580_v22  ;;  %v3270_v23 = vpack.c.bf16 %v2998_v21, %v1580_v22 }
 0x745   :  { %3428 = vrot.lane.b32.xlu1 %v3437_v28, %s3815_s15  ;;  %3271 = vmatprep.subr.bf16.mxu1 %v3270_v23 }
 0x746   :  { %3273 = vmatpush3.bf16.msra.mxu1 %v3270_v23 }
 0x747   :  { %3286 = vmatprep.subr.bf16.mxu1 %v3810_v12 }
 0x749   :  { %3433 = vrot.lane.b32.xlu1 %v3432_v19, %s3814_s27  ;;  %3023 = vmatmul.mubr.msk.f32.vlgmr.msra.gmra.mrb[20].mxu1 %vm536_vm2, %v4213_v33 }
 0x74a   :  { %3055 = vmatprep.mubr.msk.f32.mxu1 %vm3811_vm1, %v3812_v15 }
 0x79d   :  { %v1664_v24 = vpop.permute.xlu0 %1663 }
 0x79e   :  { %1762 = vrot.lane.b32.xlu0 %v1664_v24, %s3815_s15  ;;  %1872 = vrot.lane.b32.xlu1 %v1664_v24, %s3814_s27 }
 0x7a2   :  { %3438 = vrot.lane.b32.xlu0 %v3437_v28, %s3814_s27 }
 0x7b3   :  { %v3424_v25 = vpop.permute.xlu0 %3423 }
 0x7b4   :  { %v3426_v26 = vunpack.i.h.bf16 %v3424_v25  ;;  %v3425_v27 = vunpack.i.l.bf16 %v3424_v25 }
 0x7b6   :  { %v3278_v29 = vpack.c.bf16 %v3426_v26, %v3425_v27 }
 0x7b7   :  { %v3429_v30 = vpop.permute.xlu1 %3428 }
 0x7b8   :  { %v3431_v31 = vunpack.i.h.bf16 %v3429_v30  ;;  %v3430_v32 = vunpack.i.l.bf16 %v3429_v30  ;;  %3279 = vmatprep.subr.bf16.mxu0 %v3278_v29 }
 0x7b9   :  { %3281 = vmatpush3.bf16.msra.mxu0 %v3278_v29 }
 0x7ba   :  { %v3282_v33 = vpack.c.bf16 %v3431_v31, %v3430_v32 }
 0x7bb   :  { %v3434_v34 = vpop.permute.xlu1 %3433 }
 0x7bc   :  { %v3436_v35 = vunpack.i.h.bf16 %v3434_v34  ;;  %v3435_v37 = vunpack.i.l.bf16 %v3434_v34  ;;  %3283 = vmatprep.subr.bf16.mxu0 %v3282_v33 }
 0x7bd   :  { %3285 = vmatpush3.bf16.msra.mxu0 %v3282_v33 }
 0x7be   :  { %v3287_v38 = vpack.c.bf16 %v3436_v35, %v3435_v37 }
 0x7c0   :  { %3288 = vmatpush3.bf16.msra.mxu1 %v3287_v38 }
 0x7c1   :  { %3289 = vmatprep.subr.bf16.mxu1 %v3810_v12 }
 0x810   :  { %v1763_v44 = vpop.permute.xlu0 %1762  ;;  %v1873_v54 = vpop.permute.xlu1 %1872 }
 0x811   :  { %3037 = vmatprep.subr.mxu0 %v1763_v44 }
 0x812   :  { %3038 = vmatpush3.msra.mxu0 %v1763_v44 }
 0x813   :  { %3040 = vmatmul.mubr.msk.f32.vlgmr.msra.gmra.mrb[20].mxu0 %vm649_vm3, %v4252_v2  ;;  %3293 = vmatprep.subr.bf16.mxu0 %v3292_v43 }
 0x814   :  { %v3439_v46 = vpop.permute.xlu0 %3438  ;;  %3042 = vmatprep.mubr.msk.f32.mxu0 %vm649_vm3, %v4257_v4  ;;  %3295 = vmatpush3.bf16.msra.mxu0 %v3292_v43 }
 0x815   :  { %v3441_v47 = vunpack.i.h.bf16 %v3439_v46  ;;  %v3440_v48 = vunpack.i.l.bf16 %v3439_v46  ;;  %3297 = vmatprep.subr.bf16.mxu0 %v3296_v45 }
 0x817   :  { %v3290_v49 = vpack.c.bf16 %v3441_v47, %v3440_v48  ;;  %3043 = vmatmul.mubr.msk.f32.gmra.mrb[22].mxu0 %vm649_vm3, %v4266_v7 }
 0x818   :  { %3299 = vmatpush3.bf16.msra.mxu0 %v3296_v45 }
 0x819   :  { %3291 = vmatpush3.bf16.msra.mxu1 %v3290_v49  ;;  %3308 = vmatprep.subr.bf16.mxu0 %v3810_v12 }
 0x81a   :  { %3053 = vmatprep.subr.mxu1 %v3812_v15 }
 0x81c   :  { %v3024_v55 = vpop.f32.mrb[20].mxu1 }
 0x81d   :  { %3054 = vmatpush3.msra.mxu1 %v1873_v54  ;;  %v1741_v56 = vmax.f32 %v3024_v55, 0.0  ;;  %v1731_v57 = vpop.f32.mrb[21].mxu1  ;;  %v2307_v55 = vld [vmem:[%s4458_s18] sm:$0x3] }
 0x81e   :  { %3056 = vmatmul.mubr.msk.f32.vlgmr.msra.gmra.mrb[22].mxu1 %vm770_vm4, %v4233_v50  ;;  %v1740_v58 = vmax.f32 %v1731_v57, 0.0  ;;  %3301 = vmatprep.subr.bf16.mxu1 %v3300_v53  ;;  %v3309_v50 = vpack.c.bf16 %v2138_v1, %v2137_v0  ;;  %v2387_v57 = vld [vmem:[#allocation23 + $0x10] sm:$0xff]  ;;  %v2473_v1 = vld [vmem:[%s4461_s21 + $0x18] sm:$0xff] }
 0x81f   :  { %v1743_v59 = vmul.f32 0.5, %v1741_v56  ;;  %3303 = vmatpush3.bf16.msra.mxu1 %v3300_v53  ;;  %v2386_v53 = vld [vmem:[#allocation23 + $0x8] sm:$0xff] }
 0x820   :  { %v1742_v60 = vmul.f32 0.5, %v1740_v58  ;;  %3305 = vmatprep.subr.bf16.mxu1 %v3304_v63  ;;  %v3333_v56 = vpack.c.bf16 %v2386_v53, %v2385_v52  ;;  %v2388_v58 = vld [vmem:[#allocation23 + $0x18] sm:$0xff] }
 0x822   :  { %3066 = vmatprep.mubr.msk.f32.mxu0 %vm858_vm5, %v1742_v60  ;;  %v2470_v60 = vld [vmem:[%s4461_s21] sm:$0xff] }
 0x823   :  { %3067 = vmatmul.mubr.msk.f32.vlgmr.msra.gmra.mrb[24].mxu0 %vm858_vm5, %v1743_v59  ;;  %3307 = vmatpush3.bf16.msra.mxu1 %v3304_v63  ;;  %v3336_v59 = vpack.c.bf16 %v2388_v58, %v2387_v57  ;;  %v3339_v62 = vpack.c.bf16 %v2471_v61, %v2470_v60 }
 0x824   :  { %3091 = vmatprep.mubr.msk.f32.mxu0 %vm3811_vm1, %v3812_v15  ;;  %3310 = vmatpush3.bf16.msra.mxu0 %v3309_v50 }
 0x825   :  { %3311 = vmatprep.subr.bf16.mxu0 %v3810_v12 }
 0x828   :  { %3313 = vmatpush3.bf16.msra.mxu0 %v3312_v6 }
 0x829   :  { %3326 = vmatprep.subr.bf16.mxu0 %v3810_v12 }
 0x8e6   :  { %v3041_v8 = vpop.f32.mrb[20].mxu0 }
 0x8e7   :  { %v1857_v9 = vmax.f32 %v3041_v8, 0.0  ;;  %v1837_v10 = vpop.f32.mrb[21].mxu0 }
 0x8e8   :  { %v1856_v11 = vmax.f32 %v1837_v10, 0.0 }
 0x8e9   :  { %v1861_v16 = vmul.f32 0.33333334, %v1857_v9  ;;  %v2645_v9 = vld [vmem:[%s4462_s22] ss:$0 sm:$0xff] }
 0x8ea   :  { %v1860_v13 = vmul.f32 0.33333334, %v1856_v11  ;;  %v3044_v14 = vpop.f32.mrb[22].mxu0 }
 0x8eb   :  { %v1859_v17 = vmax.f32 %v3044_v14, 0.0  ;;  %v1847_v18 = vpop.f32.mrb[23].mxu0 }
 0x8ec   :  { %v1858_v19 = vmax.f32 %v1847_v18, 0.0  ;;  %3077 = vmatprep.mubr.msk.f32.mxu1 %vm858_vm5, %v1860_v13 }
 0x8ed   :  { %3078 = vmatmul.mubr.msk.f32.vlgmr.msra.gmra.mrb[24].mxu1 %vm858_vm5, %v1861_v16  ;;  %v1863_v21 = vmul.f32 0.33333334, %v1859_v17 }
 0x8ee   :  { %v1862_v20 = vmul.f32 0.33333334, %v1858_v19 }
 0x8f0   :  { %3080 = vmatprep.mubr.msk.f32.mxu1 %vm858_vm5, %v1862_v20 }
 0x8f1   :  { %3081 = vmatmul.mubr.msk.f32.gmra.mrb[26].mxu1 %vm858_vm5, %v1863_v21  ;;  %v1945_v22 = vpop.f32.mrb[22].mxu1 }
 0x8f2   :  { %v1949_v28 = vmax.f32 %v1945_v22, 0.0  ;;  %v3057_v23 = vpop.f32.mrb[23].mxu1  ;;  %3108 = vmatprep.mubr.msk.f32.mxu1 %vm649_vm3, %v4225_v36 }
 0x8f4   :  { %v1950_v24 = vmul.f32 0.5, %v1949_v28 }
 0x8f6   :  { %3092 = vmatmul.mubr.msk.f32.vlgmr.msra.gmra.mrb[26].mxu0 %vm858_vm5, %v1950_v24  ;;  %v3068_v25 = vpop.f32.mrb[24].mxu0 }
 0x8f7   :  { %v2027_v26 = vpop.f32.mrb[25].mxu0  ;;  %3122 = vmatprep.mubr.msk.f32.mxu0 %vm3811_vm1, %v3812_v15 }
 0x8f8   :  { %v3314_v27 = vpack.c.bf16 %v3068_v25, %v2027_v26 }
 0x8fa   :  { %3315 = vmatprep.subr.bf16.mxu1 %v3314_v27 }
 0x8fb   :  { %3317 = vmatpush3.bf16.msra.mxu1 %v3314_v27 }
 0x9c0   :  { %v3079_v29 = vpop.f32.mrb[24].mxu1 }
 0x9c1   :  { %v2118_v30 = vpop.f32.mrb[25].mxu1 }
 0x9c2   :  { %v3318_v31 = vpack.c.bf16 %v3079_v29, %v2118_v30 }
 0x9c4   :  { %v3082_v32 = vpop.f32.mrb[26].mxu1  ;;  %3319 = vmatprep.subr.bf16.mxu1 %v3318_v31 }
 0x9c5   :  { %v2128_v33 = vpop.f32.mrb[27].mxu1  ;;  %3321 = vmatpush3.bf16.msra.mxu1 %v3318_v31 }
 0x9c6   :  { %v3322_v34 = vpack.c.bf16 %v3082_v32, %v2128_v33 }
 0x9c8   :  { %3323 = vmatprep.subr.bf16.mxu1 %v3322_v34 }
 0x9c9   :  { %3325 = vmatpush3.bf16.msra.mxu1 %v3322_v34  ;;  %v2210_v36 = vpop.f32.mrb[26].mxu0 }
 0x9ca   :  { %v3093_v35 = vpop.f32.mrb[27].mxu0  ;;  %3106 = vmatprep.subr.mxu1 %v2210_v36 }
 0x9cd   :  { %3107 = vmatpush3.msra.mxu1 %v2210_v36 }
 0x9ce   :  { %3109 = vmatmul.mubr.msk.f32.vlgmr.msra.gmra.mrb[28].mxu1 %vm649_vm3, %v4252_v2  ;;  %3338 = vmatprep.subr.bf16.mxu1 %v3810_v12 }
 0x9cf   :  { %3111 = vmatprep.mubr.msk.f32.mxu1 %vm649_vm3, %v4257_v4  ;;  %3340 = vmatpush3.bf16.msra.mxu1 %v3339_v62 }
 0x9d0   :  { %3341 = vmatprep.subr.bf16.mxu1 %v3810_v12 }
 0x9d2   :  { %3112 = vmatmul.mubr.msk.f32.gmra.mrb[30].mxu1 %vm649_vm3, %v4266_v7 }
 0x9d3   :  { %3144 = vmatprep.mubr.msk.f32.mxu1 %vm3811_vm1, %v3812_v15 }
 0xaa1   :  { %v3110_v37 = vpop.f32.mrb[28].mxu1 }
 0xaa2   :  { %v2300_v38 = vmax.f32 %v3110_v37, 0.0  ;;  %v2280_v39 = vpop.f32.mrb[29].mxu1 }
 0xaa3   :  { %v2299_v40 = vmax.f32 %v2280_v39, 0.0 }
 0xaa4   :  { %v2304_v41 = vmul.f32 0.33333334, %v2300_v38 }
 0xaa5   :  { %v2303_v42 = vmul.f32 0.33333334, %v2299_v40  ;;  %v3113_v43 = vpop.f32.mrb[30].mxu1 }
 0xaa6   :  { %v2309_v44 = vand.u32 2147483647, %v2304_v41  ;;  %v2302_v2 = vmax.f32 %v3113_v43, 0.0  ;;  %v2290_v45 = vpop.f32.mrb[31].mxu1 }
 0xaa7   :  { %v2308_v46 = vand.u32 2147483647, %v2303_v42  ;;  %v2301_v47 = vmax.f32 %v2290_v45, 0.0 }
 0xaa8   :  { %v2306_v48 = vmul.f32 0.33333334, %v2302_v2 }
 0xaa9   :  { %v3327_v4 = vpack.c.bf16 %v2309_v44, %v2308_v46  ;;  %v2305_v49 = vmul.f32 0.33333334, %v2301_v47 }
 0xaaa   :  { %v2311_v51 = vand.u32 2147483647, %v2306_v48 }
 0xaab   :  { %v2310_v7 = vand.u32 2147483647, %v2305_v49  ;;  %3328 = vmatpush3.bf16.msra.mxu0 %v3327_v4 }
 0xaac   :  { %3329 = vmatprep.subr.bf16.mxu0 %v3810_v12 }
 0xaad   :  { %v3330_v54 = vpack.c.bf16 %v2311_v51, %v2310_v7 }
 0xaaf   :  { %3331 = vmatpush3.bf16.msra.mxu0 %v3330_v54 }
 0xab0   :  { %3332 = vmatprep.subr.bf16.mxu0 %v3810_v12 }
 0xab2   :  { %3123 = vmatmul.mubr.msk.f32.vlgmr.msra.gmra.mrb[28].mxu0 %vm858_vm5, %v2307_v55 }
 0xab3   :  { %3334 = vmatpush3.bf16.msra.mxu0 %v3333_v56  ;;  %3133 = vmatprep.mubr.msk.f32.mxu0 %vm3811_vm1, %v3812_v15  ;;  %v2472_v15 = vld [vmem:[%s4461_s21 + $0x10] sm:$0xff]  ;;  %s2573_s21 = sshll.u32 %s3816_s20, 4  ;;  %s2574_s21 = int_to_ptr.vmem [resolvable:$true] %s2573_s21 }
 0xab4   :  { %3335 = vmatprep.subr.bf16.mxu0 %v3810_v12  ;;  %v3342_v50 = vpack.c.bf16 %v2473_v1, %v2472_v15  ;;  %s3754_s22 = scalar_lea.vmem %s2574_s21, 32  ;;  %p3759_p1 = scmp.lt.s32.totalorder %s2574_s21, %s2574_s21 }
 0xab5   :  { %p3755_p0 = scmp.ne.s32.totalorder %s2574_s21, %s3754_s22  ;;  %p3760_p2 = scmp.lt.s32.totalorder %s3754_s22, %s3754_s22 }
 0xab6   :  { %3343 = vmatpush3.bf16.msra.mxu1 %v3342_v50 }
 0xab7   :  { %3337 = vmatpush3.bf16.msra.mxu0 %v3336_v59  ;;  %p3761_p3 = por %p3760_p2, %p3759_p1 }
 0xab9   :  { %p3762_p4 = pnand %p3761_p3, %p3755_p0 }
 0xb85   :  { %v2381_v63 = vpop.f32.mrb[28].mxu0 }
 0xb86   :  { %v3124_v0 = vpop.f32.mrb[29].mxu0  ;;  %3134 = vmatmul.mubr.msk.f32.vlgmr.msra.gmra.mrb[30].mxu0 %vm858_vm5, %v2381_v63 }
 0xc59   :  { %v2465_v5 = vpop.f32.mrb[30].mxu0 }
 0xc5a   :  { %v2466_v12 = vadd.f32 %v2643_v3, %v2465_v5  ;;  %v3135_v6 = vpop.f32.mrb[31].mxu0 }
 0xc5c   :  { %v2469_v8 = vmax.f32 %v2466_v12, 0.0 }
 0xc5e   :  { %3145 = vmatmul.mubr.msk.f32.vlgmr.msra.gmra.mrb[32].mxu1 %vm858_vm5, %v2469_v8 }
 0xd31   :  { %v2550_v10 = vpop.f32.mrb[32].mxu1 }
 0xd32   :  { %v2551_v11 = vadd.f32 %v2645_v9, %v2550_v10  ;;  %v3146_v13 = vpop.f32.mrb[33].mxu1 }
 0xd34   :  { %v2555_v14 = vsel %vm2554_vm6, %v2551_v11, -inf }
 0xd35   :  { %2556 = vmax.xlane.f32.xlu0 %v2555_v14 }
 0xdc2   :  { %v2557_v16 = vpop.xlane.xlu0 %2556 }
 0xdc3   :  { %v2558_v17 = vsub.f32 %v2551_v11, %v2557_v16 }
 0xdc5   :  { %v2559_v18 = vmul.f32 1.442695, %v2558_v17 }
 0xdc7   :  { %3442 = vpow2.f32 %v2559_v18 }
 0xdd1   :  { %v3443_v19 = vpop.eup %3442 }
 0xdd2   :  { %v2561_v20 = vsel %vm2554_vm6, %v3443_v19, 0.0 }
 0xdd3   :  { %2562 = vadd.xlane.f32.xlu1 %v2561_v20 }
 0xe60   :  { %v2563_v21 = vpop.xlane.xlu1 %2562 }
 0xe61   :  { %3444 = vrcp.f32 %v2563_v21 }
 0xe6b   :  { %v3445_v22 = vpop.eup %3444 }
 0xe6c   :  { %v2565_v28 = vmul.f32 %v3445_v22, %v3443_v19 }
 0xe6e   :  { %2566 = vst.msk [vmem:[#allocation25] sm:$0x3] %vm2554_vm6, %v2565_v28 }
 0xe6f   :  { %3765 = shalt.err (!%p3762_p4)
}
 0xe70   :  { %s4490_s12 = sld [smem:[#allocation43_spill]] }
 0xe76   :  { %s3766_s4 = scalar_lea.hbm %s4490_s12, 32 }
 0xe77   :  { %p3767_p5 = scmp.ne.s32.totalorder %s4490_s12, %s3766_s4  ;;  %p3770_p6 = scmp.lt.u32.totalorder %s3766_s4, %s4490_s12 }
 0xe79   :  { %p3772_p7 = pnand %p3770_p6, %p3767_p5 }
 0xe7b   :  { %3775 = shalt.err (!%p3772_p7)
}
 0xe7c   :  { %2576 = dma.vmem_to_hbm [thread:$0]  %s2574_s21, 32, %s4490_s12, [#allocation4]  }
 0xe7d   :  { %3792 = dma.done.wait [#allocation4], 32  }
 0xe7e   :  { %3793 = vsyncadd [#allocation4], 4294967264 }
 0xe7f   :  { %2580 = vsyncpa [#allocation3], 1 }
 0xe80   :  { %2581 = vsyncpa [#allocation6], 1 }
 0xe81   :  { %2582 = vsyncpa [#allocation9], 1 }
 0xe82   :  { %2583 = vsyncpa [#allocation12], 1 }
 0xe83   :  { %2584 = vsyncpa [#allocation15], 1 }
 0xe84   :  { %2585 = vsyncpa [#allocation18], 1 }
 0xe85   :  { %2586 = vsyncpa [#allocation21], 1 }
 0xe86   :  { %2587 = vsyncpa [#allocation24], 1 }
 0xe87   :  { %2588 = vsyncpa [#allocation4], 1 }

</bundles_post_ra>
